<compile_context>
chip_gen: v6e
topology: v6e:2x2x1
jax: 0.10.0
libtpu: 0.0.40
codegen_flags: <defaults>
</compile_context>

<pallas_src>
import jax
import jax.numpy as jnp
from jax.experimental import pallas as pl
from jax.experimental.pallas import tpu as pltpu


def _round_up(x, m):
    return (x + m - 1) // m * m


def mlp_kernel(x_ref, w1_ref, b1_ref, w2_ref, b2_ref, o_ref):
    # x arrives f32; cast to bf16 right before the MXU (VPU has slack under the MXU).
    x_bf = x_ref[...].astype(jnp.bfloat16)
    h = jnp.dot(x_bf, w1_ref[...], preferred_element_type=jnp.float32)   # bf16 MXU, f32 acc
    h = h + b1_ref[...]                                                   # (1, hidden) broadcast
    h = jnp.maximum(h, 0.0)                                               # ReLU
    # Dropout(p) in eval mode is identity.
    out = jnp.dot(h.astype(jnp.bfloat16), w2_ref[...],
                  preferred_element_type=jnp.float32)
    out = out + b2_ref[...]                                               # (1, out_pad) broadcast
    o_ref[...] = out.astype(o_ref.dtype)


def prepare_params(w1, b1, w2, b2):
    """One-time conversion of module parameters into kernel layout/dtypes.

    Weights -> bf16 MXU operands; biases -> f32 (1, dim) rows (accepts 1-D PyTorch biases).
    W2/b2 are zero-padded on the output dim to a multiple of 128 so the kernel writes a
    lane-dense output block (unmasked stores).
    """
    in_dim, hidden = w1.shape
    out_dim = w2.shape[1]
    out_pad = _round_up(out_dim, 128)

    w1_bf = w1.astype(jnp.bfloat16)
    w2_bf = jnp.zeros((hidden, out_pad), jnp.bfloat16).at[:, :out_dim].set(
        w2.astype(jnp.bfloat16))
    b1_f = jnp.reshape(b1, (1, hidden)).astype(jnp.float32)
    b2_f = jnp.zeros((1, out_pad), jnp.float32).at[:, :out_dim].set(
        jnp.reshape(b2, (1, out_dim)).astype(jnp.float32))
    return {"w1": w1_bf, "b1": b1_f, "w2": w2_bf, "b2": b2_f, "out_dim": out_dim}


def _choose_tile_b(b_pad, in_dim, hidden, out_pad):
    # Candidates: b_pad itself (single tile) or divisors of b_pad, largest first.
    candidates = [b_pad] + [t for t in (2048, 1024, 512, 256, 128, 64, 32, 16, 8)
                            if t < b_pad and b_pad % t == 0]
    # Per-tile VMEM driver: (tile_b, hidden) f32 intermediate + double-buffered x / out tiles.
    budget = 24 << 20
    best = 8
    for t in candidates:
        per_tile = t * hidden * 4 + 2 * t * in_dim * 4 + 2 * t * out_pad * 4
        if per_tile <= budget:
            best = t
            break
    # Keep >= 2 grid steps when there is enough batch so v7x's two TensorCores both get work
    # under dimension_semantics=("parallel",); on v5e/v6e the extra step costs ~0.35 us.
    if best == b_pad and b_pad >= 512 and (b_pad // 2) % 8 == 0:
        best = b_pad // 2
    return best


def basic_module_forward(x, params, *, single_buffer_weights=True):
    w1, b1, w2, b2 = params["w1"], params["b1"], params["w2"], params["b2"]
    out_dim = params["out_dim"]
    B, in_dim = x.shape
    hidden = w1.shape[1]
    out_pad = w2.shape[1]

    x_f = x.astype(jnp.float32)          # kernel casts to bf16 on the fly
    b_pad = _round_up(B, 8)
    if b_pad != B:
        x_f = jnp.pad(x_f, ((0, b_pad - B), (0, 0)))

    tile_b = _choose_tile_b(b_pad, in_dim, hidden, out_pad)
    grid = (b_pad // tile_b,)

    # Scoped VMEM sized from actual buffers (resident weights single copy + x/out double buffers
    # + f32 intermediate), with headroom; capped at v7x's 64 MiB physical VMEM.
    weight_bytes = w1.size * 2 + w2.size * 2 + b1.size * 4 + b2.size * 4
    tile_bytes = 2 * tile_b * in_dim * 4 + 2 * tile_b * out_pad * 4 + tile_b * hidden * 4
    vmem_limit = min(max(2 * (weight_bytes + tile_bytes) + (4 << 20), 32 << 20), 64 << 20)

    flops = 2 * b_pad * (in_dim * hidden + hidden * out_pad)
    bytes_accessed = (x_f.size * 4 + w1.size * 2 + w2.size * 2
                      + b1.size * 4 + b2.size * 4 + b_pad * out_pad * 4)
    cost = pl.CostEstimate(flops=flops, transcendentals=0, bytes_accessed=bytes_accessed)

    def build(weight_mode):
        return pl.pallas_call(
            mlp_kernel,
            out_shape=jax.ShapeDtypeStruct((b_pad, out_pad), jnp.float32),
            grid_spec=pltpu.PrefetchScalarGridSpec(
                num_scalar_prefetch=0,
                grid=grid,
                in_specs=[
                    pl.BlockSpec((tile_b, in_dim), lambda i: (i, 0)),                             # x tile (pipelined)
                    pl.BlockSpec((in_dim, hidden), lambda i: (0, 0), pipeline_mode=weight_mode),  # W1 (resident)
                    pl.BlockSpec((1, hidden), lambda i: (0, 0), pipeline_mode=weight_mode),       # b1
                    pl.BlockSpec((hidden, out_pad), lambda i: (0, 0), pipeline_mode=weight_mode), # W2 (resident)
                    pl.BlockSpec((1, out_pad), lambda i: (0, 0), pipeline_mode=weight_mode),      # b2
                ],
                out_specs=pl.BlockSpec((tile_b, out_pad), lambda i: (i, 0)),                      # lane-dense
            ),
            compiler_params=pltpu.CompilerParams(
                dimension_semantics=("parallel",),
                vmem_limit_bytes=vmem_limit,
            ),
            cost_estimate=cost,
        )

    if single_buffer_weights:
        try:
            out = build(pl.Buffered(buffer_count=1))(x_f, w1, b1, w2, b2)
        except Exception:
            # Graceful fallback for JAX versions that reject buffer_count=1 BlockSpecs.
            out = build(None)(x_f, w1, b1, w2, b2)
    else:
        out = build(None)(x_f, w1, b1, w2, b2)

    if b_pad != B or out_pad != out_dim:
        out = out[:B, :out_dim]
    return out.astype(x.dtype)


def reference_forward(x, w1, b1, w2, b2):
    h = jnp.maximum(x @ w1 + jnp.reshape(b1, (1, -1)), 0.0)
    return h @ w2 + jnp.reshape(b2, (1, -1))


if __name__ == "__main__":
    # BasicModule(inDim=64, outDim=16, hidden_dim=256); batch 512 -> two 256-row grid steps
    # (keeps both v7x TensorCores busy), no row padding, still only a few hundred KiB of VMEM.
    B, in_dim, hidden_dim, out_dim = 512, 64, 256, 16

    key = jax.random.PRNGKey(0)
    kx, kw1, kb1, kw2, kb2 = jax.random.split(key, 5)

    x = jax.random.normal(kx, (B, in_dim), dtype=jnp.float32)
    # PyTorch-like uniform fan-in init; biases are 1-D exactly like nn.Linear's.
    lim1 = 1.0 / (in_dim ** 0.5)
    lim2 = 1.0 / (hidden_dim ** 0.5)
    w1 = jax.random.uniform(kw1, (in_dim, hidden_dim), minval=-lim1, maxval=lim1, dtype=jnp.float32)
    b1 = jax.random.uniform(kb1, (hidden_dim,), minval=-lim1, maxval=lim1, dtype=jnp.float32)
    w2 = jax.random.uniform(kw2, (hidden_dim, out_dim), minval=-lim2, maxval=lim2, dtype=jnp.float32)
    b2 = jax.random.uniform(kb2, (out_dim,), minval=-lim2, maxval=lim2, dtype=jnp.float32)

    params = prepare_params(w1, b1, w2, b2)   # one-time weight conversion (init time)

    out = basic_module_forward(x, params)
    out = jax.block_until_ready(out)

    ref = reference_forward(x, w1, b1, w2, b2)
    assert out.shape == (B, out_dim)
    # bf16 MXU operands (f32 accumulation) -> loosened tolerance vs the pure-f32 reference.
    assert jnp.allclose(out, ref, atol=2e-2, rtol=2e-2), "mismatch vs reference"

    print("KERNEL_OK")
</pallas_src>

<mosaic_0001>
module attributes {stable_mosaic.version = 11 : i64} {
  func.func @mlp_kernel(%arg0: i32, %arg1: memref<256x64xf32, #tpu.memory_space<vmem>>, %arg2: memref<64x256xbf16, #tpu.memory_space<vmem>>, %arg3: memref<1x256xf32, #tpu.memory_space<vmem>>, %arg4: memref<256x128xbf16, #tpu.memory_space<vmem>>, %arg5: memref<1x128xf32, #tpu.memory_space<vmem>>, %arg6: memref<256x128xf32, #tpu.memory_space<vmem>>) attributes {dimension_semantics = [#tpu.dimension_semantics<parallel>], iteration_bounds = array<i64: 2>, scalar_prefetch = 0 : i64, scratch_operands = 0 : i64, tpu.core_type = #tpu.core_type<tc>, window_params = [{transform_indices = @transform_0, window_bounds = array<i64: 256, 64>}, {pipeline_mode = #tpu.pipeline_mode<synchronous>, transform_indices = @transform_1, window_bounds = array<i64: 64, 256>}, {pipeline_mode = #tpu.pipeline_mode<synchronous>, transform_indices = @transform_2, window_bounds = array<i64: 1, 256>}, {pipeline_mode = #tpu.pipeline_mode<synchronous>, transform_indices = @transform_3, window_bounds = array<i64: 256, 128>}, {pipeline_mode = #tpu.pipeline_mode<synchronous>, transform_indices = @transform_4, window_bounds = array<i64: 1, 128>}, {transform_indices = @transform_5, window_bounds = array<i64: 256, 128>}]} {
    %c0 = arith.constant 0 : index
    %c0_0 = arith.constant 0 : index
    %0 = vector.load %arg1[%c0, %c0_0] : memref<256x64xf32, #tpu.memory_space<vmem>>, vector<256x64xf32>
    %1 = arith.truncf %0 : vector<256x64xf32> to vector<256x64xbf16>
    %c0_1 = arith.constant 0 : index
    %c0_2 = arith.constant 0 : index
    %2 = vector.load %arg2[%c0_1, %c0_2] : memref<64x256xbf16, #tpu.memory_space<vmem>>, vector<64x256xbf16>
    %cst = arith.constant dense<0.000000e+00> : vector<256x256xf32>
    %3 = tpu.matmul %1, %2, %cst {dimension_numbers = #tpu.dot_dimension_numbers<[1], [0], [0], [1], [0, 0, 1, 1], [], []>} : vector<256x64xbf16>, vector<64x256xbf16>, vector<256x256xf32> -> vector<256x256xf32>
    %c0_3 = arith.constant 0 : index
    %c0_4 = arith.constant 0 : index
    %4 = vector.load %arg3[%c0_3, %c0_4] : memref<1x256xf32, #tpu.memory_space<vmem>>, vector<1x256xf32>
    %5 = vector.broadcast %4 : vector<1x256xf32> to vector<256x256xf32>
    %6 = arith.addf %3, %5 : vector<256x256xf32>
    %cst_5 = arith.constant 0.000000e+00 : f32
    %7 = vector.broadcast %cst_5 : f32 to vector<256x256xf32>
    %8 = arith.maximumf %6, %7 : vector<256x256xf32>
    %9 = arith.truncf %8 : vector<256x256xf32> to vector<256x256xbf16>
    %c0_6 = arith.constant 0 : index
    %c0_7 = arith.constant 0 : index
    %10 = vector.load %arg4[%c0_6, %c0_7] : memref<256x128xbf16, #tpu.memory_space<vmem>>, vector<256x128xbf16>
    %cst_8 = arith.constant dense<0.000000e+00> : vector<256x128xf32>
    %11 = tpu.matmul %9, %10, %cst_8 {dimension_numbers = #tpu.dot_dimension_numbers<[1], [0], [0], [1], [0, 0, 1, 1], [], []>} : vector<256x256xbf16>, vector<256x128xbf16>, vector<256x128xf32> -> vector<256x128xf32>
    %c0_9 = arith.constant 0 : index
    %c0_10 = arith.constant 0 : index
    %12 = vector.load %arg5[%c0_9, %c0_10] : memref<1x128xf32, #tpu.memory_space<vmem>>, vector<1x128xf32>
    %13 = vector.broadcast %12 : vector<1x128xf32> to vector<256x128xf32>
    %14 = arith.addf %11, %13 : vector<256x128xf32>
    %c0_11 = arith.constant 0 : index
    %c0_12 = arith.constant 0 : index
    %15 = vector.load %arg6[%c0_11, %c0_12] : memref<256x128xf32, #tpu.memory_space<vmem>>, vector<256x128xf32>
    tpu.vector_store %arg6[%c0_11, %c0_12], %14 {strides = array<i32>} : memref<256x128xf32, #tpu.memory_space<vmem>>, vector<256x128xf32>,
    return
  }
  func.func @transform_0(%arg0: i32) -> (i32, i32) {
    %c0_i32 = arith.constant 0 : i32
    %c0_i32_0 = arith.constant 0 : i32
    return %arg0, %c0_i32 : i32, i32
  }
  func.func @transform_1(%arg0: i32) -> (i32, i32) {
    %c0_i32 = arith.constant 0 : i32
    %c0_i32_0 = arith.constant 0 : i32
    %c0_i32_1 = arith.constant 0 : i32
    return %c0_i32, %c0_i32_0 : i32, i32
  }
  func.func @transform_2(%arg0: i32) -> (i32, i32) {
    %c0_i32 = arith.constant 0 : i32
    %c0_i32_0 = arith.constant 0 : i32
    %c0_i32_1 = arith.constant 0 : i32
    return %c0_i32, %c0_i32_0 : i32, i32
  }
  func.func @transform_3(%arg0: i32) -> (i32, i32) {
    %c0_i32 = arith.constant 0 : i32
    %c0_i32_0 = arith.constant 0 : i32
    %c0_i32_1 = arith.constant 0 : i32
    return %c0_i32, %c0_i32_0 : i32, i32
  }
  func.func @transform_4(%arg0: i32) -> (i32, i32) {
    %c0_i32 = arith.constant 0 : i32
    %c0_i32_0 = arith.constant 0 : i32
    %c0_i32_1 = arith.constant 0 : i32
    return %c0_i32, %c0_i32_0 : i32, i32
  }
  func.func @transform_5(%arg0: i32) -> (i32, i32) {
    %c0_i32 = arith.constant 0 : i32
    %c0_i32_0 = arith.constant 0 : i32
    return %arg0, %c0_i32 : i32, i32
  }
}

module attributes {stable_mosaic.version = 11 : i64} {
  func.func @mlp_kernel(%arg0: i32, %arg1: memref<256x64xf32, #tpu.memory_space<vmem>>, %arg2: memref<64x256xbf16, #tpu.memory_space<vmem>>, %arg3: memref<1x256xf32, #tpu.memory_space<vmem>>, %arg4: memref<256x128xbf16, #tpu.memory_space<vmem>>, %arg5: memref<1x128xf32, #tpu.memory_space<vmem>>, %arg6: memref<256x128xf32, #tpu.memory_space<vmem>>) attributes {dimension_semantics = [#tpu.dimension_semantics<parallel>], iteration_bounds = array<i64: 2>, scalar_prefetch = 0 : i64, scratch_operands = 0 : i64, tpu.core_type = #tpu.core_type<tc>, window_params = [{transform_indices = @transform_0, window_bounds = array<i64: 256, 64>}, {pipeline_mode = #tpu.pipeline_mode<synchronous>, transform_indices = @transform_1, window_bounds = array<i64: 64, 256>}, {pipeline_mode = #tpu.pipeline_mode<synchronous>, transform_indices = @transform_2, window_bounds = array<i64: 1, 256>}, {pipeline_mode = #tpu.pipeline_mode<synchronous>, transform_indices = @transform_3, window_bounds = array<i64: 256, 128>}, {pipeline_mode = #tpu.pipeline_mode<synchronous>, transform_indices = @transform_4, window_bounds = array<i64: 1, 128>}, {transform_indices = @transform_5, window_bounds = array<i64: 256, 128>}]} {
    %c0 = arith.constant 0 : index
    %c0_0 = arith.constant 0 : index
    %0 = vector.load %arg1[%c0, %c0_0] : memref<256x64xf32, #tpu.memory_space<vmem>>, vector<256x64xf32>
    %1 = arith.truncf %0 : vector<256x64xf32> to vector<256x64xbf16>
    %c0_1 = arith.constant 0 : index
    %c0_2 = arith.constant 0 : index
    %2 = vector.load %arg2[%c0_1, %c0_2] : memref<64x256xbf16, #tpu.memory_space<vmem>>, vector<64x256xbf16>
    %cst = arith.constant dense<0.000000e+00> : vector<256x256xf32>
    %3 = tpu.matmul %1, %2, %cst {dimension_numbers = #tpu.dot_dimension_numbers<[1], [0], [0], [1], [0, 0, 1, 1], [], []>} : vector<256x64xbf16>, vector<64x256xbf16>, vector<256x256xf32> -> vector<256x256xf32>
    %c0_3 = arith.constant 0 : index
    %c0_4 = arith.constant 0 : index
    %4 = vector.load %arg3[%c0_3, %c0_4] : memref<1x256xf32, #tpu.memory_space<vmem>>, vector<1x256xf32>
    %5 = vector.broadcast %4 : vector<1x256xf32> to vector<256x256xf32>
    %6 = arith.addf %3, %5 : vector<256x256xf32>
    %cst_5 = arith.constant 0.000000e+00 : f32
    %7 = vector.broadcast %cst_5 : f32 to vector<256x256xf32>
    %8 = arith.maximumf %6, %7 : vector<256x256xf32>
    %9 = arith.truncf %8 : vector<256x256xf32> to vector<256x256xbf16>
    %c0_6 = arith.constant 0 : index
    %c0_7 = arith.constant 0 : index
    %10 = vector.load %arg4[%c0_6, %c0_7] : memref<256x128xbf16, #tpu.memory_space<vmem>>, vector<256x128xbf16>
    %cst_8 = arith.constant dense<0.000000e+00> : vector<256x128xf32>
    %11 = tpu.matmul %9, %10, %cst_8 {dimension_numbers = #tpu.dot_dimension_numbers<[1], [0], [0], [1], [0, 0, 1, 1], [], []>} : vector<256x256xbf16>, vector<256x128xbf16>, vector<256x128xf32> -> vector<256x128xf32>
    %c0_9 = arith.constant 0 : index
    %c0_10 = arith.constant 0 : index
    %12 = vector.load %arg5[%c0_9, %c0_10] : memref<1x128xf32, #tpu.memory_space<vmem>>, vector<1x128xf32>
    %13 = vector.broadcast %12 : vector<1x128xf32> to vector<256x128xf32>
    %14 = arith.addf %11, %13 : vector<256x128xf32>
    %c0_11 = arith.constant 0 : index
    %c0_12 = arith.constant 0 : index
    %15 = vector.load %arg6[%c0_11, %c0_12] : memref<256x128xf32, #tpu.memory_space<vmem>>, vector<256x128xf32>
    tpu.vector_store %arg6[%c0_11, %c0_12], %14 {strides = array<i32>} : memref<256x128xf32, #tpu.memory_space<vmem>>, vector<256x128xf32>,
    return
  }
  func.func @transform_0(%arg0: i32) -> (i32, i32) {
    %c0_i32 = arith.constant 0 : i32
    %c0_i32_0 = arith.constant 0 : i32
    return %arg0, %c0_i32 : i32, i32
  }
  func.func @transform_1(%arg0: i32) -> (i32, i32) {
    %c0_i32 = arith.constant 0 : i32
    %c0_i32_0 = arith.constant 0 : i32
    %c0_i32_1 = arith.constant 0 : i32
    return %c0_i32, %c0_i32_0 : i32, i32
  }
  func.func @transform_2(%arg0: i32) -> (i32, i32) {
    %c0_i32 = arith.constant 0 : i32
    %c0_i32_0 = arith.constant 0 : i32
    %c0_i32_1 = arith.constant 0 : i32
    return %c0_i32, %c0_i32_0 : i32, i32
  }
  func.func @transform_3(%arg0: i32) -> (i32, i32) {
    %c0_i32 = arith.constant 0 : i32
    %c0_i32_0 = arith.constant 0 : i32
    %c0_i32_1 = arith.constant 0 : i32
    return %c0_i32, %c0_i32_0 : i32, i32
  }
  func.func @transform_4(%arg0: i32) -> (i32, i32) {
    %c0_i32 = arith.constant 0 : i32
    %c0_i32_0 = arith.constant 0 : i32
    %c0_i32_1 = arith.constant 0 : i32
    return %c0_i32, %c0_i32_0 : i32, i32
  }
  func.func @transform_5(%arg0: i32) -> (i32, i32) {
    %c0_i32 = arith.constant 0 : i32
    %c0_i32_0 = arith.constant 0 : i32
    return %arg0, %c0_i32 : i32, i32
  }
}

</mosaic_0001>

<bundles_post_ra>
// kernel: tpu_custom_call.1
= control target key start
LH: loop header
LB: loop body
LE: loop exit
PB: predicated region body
PF: predicated region fallthrough
CT: control target
= control target key end

     0   :  { %10 = vsyncpa [#allocation3], 0  ;;  %s1811_s0 = inlined_call_operand.vmem [shape: f32[512,64], index: 0, kind: input, shape index: {}]   ;;  %s1812_s1 = inlined_call_operand.vmem [shape: bf16[64,256], index: 1, kind: input, shape index: {}]   ;;  %s1813_s2 = inlined_call_operand.vmem [shape: f32[1,256], index: 2, kind: input, shape index: {}]   ;;  %s1814_s3 = inlined_call_operand.vmem [shape: bf16[256,128], index: 3, kind: input, shape index: {}]   ;;  %s1815_s4 = inlined_call_operand.vmem [shape: f32[1,128], index: 4, kind: input, shape index: {}]   ;;  %s1816_s5 = inlined_call_operand.hbm [shape: f32[512,128], index: 5, kind: output, shape index: {}]  }
   0x1   :  { %12 = vsyncpa [#allocation3 + $0x1], 0  ;;  %s1425_s18 = smov 0   ;;  %s1427_s19 = smov 0  }
   0x2   :  { %s1429_s20 = smov 0   ;;  %s1431_s21 = smov 0  }
   0x3 LB: > { %s1446_s22 = sadd.s32 4294967295, %s1389_s21   ;;  %s1077_s23 = sadd.s32 4294967294, %s1389_s21   ;;  %s1389_s21 = sphi %s1431_s21, %s1822_s21   ;;  %s1385_s20 = sphi %s1429_s20, %s1821_s20   ;;  %s1381_s19 = sphi %s1427_s19, %s1820_s19   ;;  %s1377_s18 = sphi %s1425_s18, %s1819_s18  }
   0x4   : > { %s1450_s24 = sadd.s32 1, %s1389_s21   ;;  %s135_s25 = sadd.s32 1, %s1385_s20 }
   0x5   : > { %s132_s26 = ssub.s32 %s1389_s21, %s1450_s24  ;;  %p145_p0 = scmp.ne.s32.totalorder %s1385_s20, %s1381_s19 }
   0x6   : > { %p133_p1 = scmp.eq.s32.totalorder %s132_s26, 0  ;;  %p146_p2 = scmp.eq.s32.totalorder %s1446_s22, 1 }
   0x7   : > { %p151_p3 = scmp.ne.s32.totalorder %s1381_s19, %s1377_s18  ;;  %p152_p4 = scmp.eq.s32.totalorder %s1077_s23, 1 }
   0x8   : > { %s1461_s27 = scalar_select %p133_p1, %s1385_s20, %s135_s25  }
   0x9   : > { %p1463_p5 = por %p146_p2, %p145_p0  ;;  %p1467_p6 = por %p152_p4, %p151_p3 }
   0xa   : > { %p1080_p7 = scmp.ge.s32.totalorder %s1389_s21, 1  ;;  %p191_p8 = scmp.lt.s32.totalorder %s1389_s21, 3 }
   0xc   : > { %p192_p9 = pnand %p1080_p7, %p191_p8 }
   0xd   : > { %s1082_s7 = sshll.u32 (!%p192_p9), %s1446_s22, 5  ;;  %s1130_s23 = sshll.u32 (!%p192_p9), %s1446_s22, 12 }
   0xe   : > { %195 = sbr.rel (%p192_p9) target bundleno = 579 (0x243), region = 40  ;;  %p220_p10 = scmp.lt.s32.totalorder (!%p192_p9), %s1082_s7, 63 }
   0xf   : > { %s1763_s6 = scalar_lea.hbm (!%p192_p9), %s1816_s5, %s1130_s23  ;;  %s1392_s9 = smov (!%p192_p9), [#allocation2]  }
  0x10   : > { %s1333_s10 = sshll.u32 (!%p192_p9), %s1392_s9, 4  ;;  %s1334_s10 = int_to_ptr.vmem [resolvable:$false] %s1333_s10 }
  0x11   : > { %s1335_s11 = scalar_lea.vmem (!%p192_p9), %s1334_s10, 8192 }
  0x13   : > { %v1301_v0 = vld [vmem:[%s1812_s1 + $0x34] ss:$8 sps:$4 sm:$0xff]   ;;  %v1303_v1 = vld [vmem:[%s1812_s1 + $0x30] ss:$8 sps:$4 sm:$0xff]   ;;  %v1391_v2 = vmov 0   ;;  %s1824_s7 = smov (!%p220_p10, %s1082_s7), 63 }
  0x14   : > { %416 = vmatprep.mubr.bf16.mxu0 %v1391_v2  ;;  %392 = vmatprep.subr.bf16.mxu0 %v1301_v0  ;;  %v1304_v3 = vld [vmem:[%s1812_s1 + $0x24] ss:$8 sps:$4 sm:$0xff]   ;;  %v1306_v4 = vld [vmem:[%s1812_s1 + $0x20] ss:$8 sps:$4 sm:$0xff]   ;;  %v1307_v5 = vld [vmem:[%s1812_s1 + $0x14] ss:$8 sps:$4 sm:$0xff]  }
  0x15   : > { %393 = vmatpush1.bf16.msra.mxu0 %v1303_v1  ;;  %s1083_s16 = sshll.u32 %s1824_s7, 3  ;;  %v1309_v6 = vld [vmem:[%s1812_s1 + $0x10] ss:$8 sps:$4 sm:$0xff]   ;;  %v1310_v7 = vld [vmem:[%s1812_s1 + $0x4] ss:$8 sps:$4 sm:$0xff]   ;;  %vm335_vm0 = vcmask 523264  }
  0x16   : > { %394 = vmatprep.subr.bf16.mxu0 %v1304_v3  ;;  %s1499_s8 = scalar_lea.vmem %s1811_s0, %s1083_s16  ;;  %v1312_v8 = vld [vmem:[%s1812_s1] ss:$8 sps:$4 sm:$0xff]   ;;  %v1313_v14 = vld [vmem:[%s1814_s3 + $0x78] sm:$0xff]   ;;  %v1315_v16 = vld [vmem:[%s1814_s3 + $0x70] sm:$0xff]  }
  0x17   : > { %v227_v9 = vld [vmem:[%s1499_s8] sm:$0xff]  ;;  %v228_v10 = vld [vmem:[%s1499_s8 + $0x8] sm:$0xff]  ;;  %v229_v12 = vld [vmem:[%s1499_s8 + $0x10] sm:$0xff]  ;;  %1243 = vmatprep.subr.bf16.mxu1 %v1313_v14 }
  0x18   : > { %v259_v11 = vpack.c.bf16 %v228_v10, %v227_v9  ;;  %v230_v13 = vld [vmem:[%s1499_s8 + $0x18] sm:$0xff]  ;;  %v1316_v17 = vld [vmem:[%s1814_s3 + $0x30] sm:$0xff]   ;;  %v1317_v18 = vld [vmem:[%s1814_s3 + $0x68] sm:$0xff]   ;;  %v285_v10 = vlaneseq }
  0x19   : > { %395 = vmatpush1.bf16.msra.mxu0 %v1306_v4  ;;  %v1314_v15 = vld [vmem:[%s1814_s3 + $0x38] sm:$0xff]   ;;  %v260_v19 = vpack.c.bf16 %v230_v13, %v229_v12  ;;  %v1318_v20 = vld [vmem:[%s1814_s3 + $0x28] sm:$0xff]   ;;  %v231_v21 = vld [vmem:[%s1499_s8 + $0x20] sm:$0xff] }
  0x1a   : > { %396 = vmatprep.subr.bf16.mxu0 %v1307_v5  ;;  %1251 = vmatpush3.bf16.msra.mxu1 %v1314_v15  ;;  %v1319_v22 = vld [vmem:[%s1814_s3 + $0x60] sm:$0xff]   ;;  %v232_v23 = vld [vmem:[%s1499_s8 + $0x28] sm:$0xff]  ;;  %v1321_v25 = vld [vmem:[%s1814_s3 + $0x58] sm:$0xff]  }
  0x1b   : > { %1244 = vmatprep.subr.bf16.mxu1 %v1315_v16  ;;  %v1320_v24 = vld [vmem:[%s1814_s3 + $0x20] sm:$0xff]   ;;  %v261_v26 = vpack.c.bf16 %v232_v23, %v231_v21  ;;  %v1322_v27 = vld [vmem:[%s1814_s3 + $0x18] sm:$0xff]   ;;  %v233_v28 = vld [vmem:[%s1499_s8 + $0x30] sm:$0xff] }
  0x1c   : > { %v234_v29 = vld [vmem:[%s1499_s8 + $0x38] sm:$0xff]  ;;  %v235_v31 = vld [vmem:[%s1499_s8 + $0x40] sm:$0xff]  ;;  %v236_v32 = vld [vmem:[%s1499_s8 + $0x48] sm:$0xff] }
  0x1d   : > { %397 = vmatpush1.bf16.msra.mxu0 %v1309_v6  ;;  %v262_v30 = vpack.c.bf16 %v234_v29, %v233_v28  ;;  %v263_v33 = vpack.c.bf16 %v236_v32, %v235_v31  ;;  %v237_v34 = vld [vmem:[%s1499_s8 + $0x50] sm:$0xff]  ;;  %v238_v35 = vld [vmem:[%s1499_s8 + $0x58] sm:$0xff]  ;;  %v239_v37 = vld [vmem:[%s1499_s8 + $0x60] sm:$0xff] }
  0x1e   : > { %398 = vmatprep.subr.bf16.mxu0 %v1310_v7  ;;  %1252 = vmatpush3.bf16.msra.mxu1 %v1316_v17  ;;  %v264_v36 = vpack.c.bf16 %v238_v35, %v237_v34  ;;  %v240_v38 = vld [vmem:[%s1499_s8 + $0x68] sm:$0xff]  ;;  %v241_v40 = vld [vmem:[%s1499_s8 + $0x70] sm:$0xff]  ;;  %v242_v41 = vld [vmem:[%s1499_s8 + $0x78] sm:$0xff] }
  0x1f   : > { %1245 = vmatprep.subr.bf16.mxu1 %v1317_v18  ;;  %v265_v39 = vpack.c.bf16 %v240_v38, %v239_v37  ;;  %v266_v42 = vpack.c.bf16 %v242_v41, %v241_v40  ;;  %v243_v43 = vld [vmem:[%s1499_s8 + $0x80] sm:$0xff]  ;;  %v244_v44 = vld [vmem:[%s1499_s8 + $0x88] sm:$0xff]  ;;  %v1323_v46 = vld [vmem:[%s1814_s3 + $0x50] sm:$0xff]  }
  0x20   : > { %v267_v45 = vpack.c.bf16 %v244_v44, %v243_v43  ;;  %v245_v47 = vld [vmem:[%s1499_s8 + $0x90] sm:$0xff]  ;;  %v246_v48 = vld [vmem:[%s1499_s8 + $0x98] sm:$0xff]  ;;  %v1325_v51 = vld [vmem:[%s1814_s3 + $0x48] sm:$0xff]  }
  0x21   : > { %399 = vmatpush1.bf16.msra.mxu0 %v1312_v8  ;;  %v1324_v49 = vld [vmem:[%s1814_s3 + $0x10] sm:$0xff]   ;;  %v268_v50 = vpack.c.bf16 %v246_v48, %v245_v47  ;;  %v1326_v52 = vld [vmem:[%s1814_s3 + $0x8] sm:$0xff]   ;;  %v1327_v53 = vld [vmem:[%s1814_s3 + $0x40] sm:$0xff]  }
  0x22   : > { %1131 = vmatprep.subr.bf16.mxu0 %v1313_v14  ;;  %1253 = vmatpush3.bf16.msra.mxu1 %v1318_v20  ;;  %v247_v54 = vld [vmem:[%s1499_s8 + $0xa0] sm:$0xff]  ;;  %v248_v55 = vld [vmem:[%s1499_s8 + $0xa8] sm:$0xff]  ;;  %v249_v58 = vld [vmem:[%s1499_s8 + $0xb0] sm:$0xff] }
  0x23   : > { %1246 = vmatprep.subr.bf16.mxu1 %v1319_v22  ;;  %v1328_v56 = vld [vmem:[%s1814_s3] sm:$0xff]   ;;  %v269_v57 = vpack.c.bf16 %v248_v55, %v247_v54  ;;  %v250_v59 = vld [vmem:[%s1499_s8 + $0xb8] sm:$0xff]  ;;  %v252_v62 = vld [vmem:[%s1499_s8 + $0xc8] sm:$0xff] }
  0x24   : > { %1092 = vmatmul.mubr.msk.bf16.vlgmr.msra.gmra.mxu0 %vm335_vm0, %v259_v11  ;;  %v270_v60 = vpack.c.bf16 %v250_v59, %v249_v58  ;;  %v251_v61 = vld [vmem:[%s1499_s8 + $0xc0] sm:$0xff]  ;;  %v253_v0 = vld [vmem:[%s1499_s8 + $0xd0] sm:$0xff]  ;;  %v254_v1 = vld [vmem:[%s1499_s8 + $0xd8] sm:$0xff]  ;;  %v286_v11 = vshrl.u32 %v285_v10, 7 }
  0x25   : > { %426 = vmatprep.mubr.bf16.mxu0 %v1391_v2  ;;  %1132 = vmatpush3.bf16.msra.mxu0 %v1314_v15  ;;  %v271_v63 = vpack.c.bf16 %v252_v62, %v251_v61  ;;  %v272_v3 = vpack.c.bf16 %v254_v1, %v253_v0  ;;  %v255_v4 = vld [vmem:[%s1499_s8 + $0xe0] sm:$0xff]  ;;  %v256_v5 = vld [vmem:[%s1499_s8 + $0xe8] sm:$0xff]  ;;  %v257_v7 = vld [vmem:[%s1499_s8 + $0xf0] sm:$0xff] }
  0x26   : > { %1133 = vmatprep.subr.bf16.mxu0 %v1315_v16  ;;  %1254 = vmatpush3.bf16.msra.mxu1 %v1320_v24  ;;  %v273_v6 = vpack.c.bf16 %v256_v5, %v255_v4  ;;  %v258_v8 = vld [vmem:[%s1499_s8 + $0xf8] sm:$0xff]  ;;  %v291_v12 = vsub.s32 1, %v286_v11  ;;  %v287_v13 = vsub.s32 0, %v286_v11  ;;  %v283_v14 = vld [vmem:[%s1813_s2] sm:$0x3]  ;;  %s216_s8 = sand.u32 1, %s1381_s19  }
  0x27   : > { %1247 = vmatprep.subr.bf16.mxu1 %v1321_v25  ;;  %v274_v9 = vpack.c.bf16 %v258_v8, %v257_v7  ;;  %s1081_s14 = sshll.u32 %s216_s8, 8  ;;  %s1771_s7 = scalar_lea.sflag [#allocation3], %s216_s8 }
  0x28   : > { %v1618_v16 = vrot.slane %v283_v14, %v291_v12  ;;  %s1695_s17 = scalar_lea.vmem [#allocation2], %s1081_s14 }
  0x29   : > { %1134 = vmatpush3.bf16.msra.mxu0 %v1316_v17  ;;  %v1620_v17 = vrot.slane %v283_v14, %v287_v13  ;;  %s1015_s25 = sshll.u32 %s1695_s17, 4  ;;  %s1765_s25 = int_to_ptr.vmem [resolvable:$true] %s1015_s25 }
  0x2a   : > { %1135 = vmatprep.subr.bf16.mxu0 %v1317_v18  ;;  %1255 = vmatpush3.bf16.msra.mxu1 %v1322_v27  ;;  %s1329_s22 = scalar_lea.vmem %s1765_s25, 4096  ;;  %p1336_p0 = scmp.lt.s32.totalorder %s1765_s25, %s1334_s10 }
  0x2b   : > { %1248 = vmatprep.subr.bf16.mxu1 %v1323_v46  ;;  %p1330_p11 = scmp.ne.s32.totalorder %s1765_s25, %s1329_s22  ;;  %p1337_p1 = scmp.lt.s32.totalorder %s1335_s11, %s1329_s22 }
  0x2c   : > { %1093 = vmatmul.mubr.msk.bf16.gmra.mxu0 %vm335_vm0, %v260_v19 }
  0x2d   : > { %436 = vmatprep.mubr.bf16.mxu0 %v1391_v2  ;;  %1136 = vmatpush3.bf16.msra.mxu0 %v1318_v20  ;;  %p1331_p12 = pnand %p1330_p11, %p1463_p5  ;;  %p1338_p2 = por %p1337_p1, %p1336_p0 }
  0x2e   : > { %1137 = vmatprep.subr.bf16.mxu0 %v1319_v22  ;;  %1256 = vmatpush3.bf16.msra.mxu1 %v1324_v49 }
  0x2f   : > { %1249 = vmatprep.subr.bf16.mxu1 %v1325_v51  ;;  %p1332_p13 = pneg %p1331_p12 }
  0x31   : > { %1138 = vmatpush3.bf16.msra.mxu0 %v1320_v24  ;;  %p1339_p3 = pnand %p1338_p2, %p1332_p13 }
  0x32   : > { %1139 = vmatprep.subr.bf16.mxu0 %v1321_v25  ;;  %1257 = vmatpush3.bf16.msra.mxu1 %v1326_v52 }
  0x33   : > { %1250 = vmatprep.subr.bf16.mxu1 %v1327_v53 }
  0x34   : > { %1094 = vmatmul.mubr.msk.bf16.gmra.mxu0 %vm335_vm0, %v261_v26 }
  0x35   : > { %446 = vmatprep.mubr.bf16.mxu0 %v1391_v2  ;;  %1140 = vmatpush3.bf16.msra.mxu0 %v1322_v27 }
  0x36   : > { %1141 = vmatprep.subr.bf16.mxu0 %v1323_v46  ;;  %1258 = vmatpush3.bf16.msra.mxu1 %v1328_v56 }
  0x39   : > { %1142 = vmatpush3.bf16.msra.mxu0 %v1324_v49 }
  0x3a   : > { %1143 = vmatprep.subr.bf16.mxu0 %v1325_v51 }
  0x3c   : > { %1095 = vmatmul.mubr.msk.bf16.gmra.mxu0 %vm335_vm0, %v262_v30 }
  0x3d   : > { %456 = vmatprep.mubr.bf16.mxu0 %v1391_v2  ;;  %1144 = vmatpush3.bf16.msra.mxu0 %v1326_v52 }
  0x3e   : > { %1145 = vmatprep.subr.bf16.mxu0 %v1327_v53 }
  0x41   : > { %1146 = vmatpush3.bf16.msra.mxu0 %v1328_v56 }
  0x44   : > { %1096 = vmatmul.mubr.msk.bf16.gmra.mxu0 %vm335_vm0, %v263_v33 }
  0x45   : > { %466 = vmatprep.mubr.bf16.mxu0 %v1391_v2 }
  0x4c   : > { %1097 = vmatmul.mubr.msk.bf16.gmra.mxu0 %vm335_vm0, %v264_v36 }
  0x4d   : > { %476 = vmatprep.mubr.bf16.mxu0 %v1391_v2 }
  0x54   : > { %1098 = vmatmul.mubr.msk.bf16.gmra.mxu0 %vm335_vm0, %v265_v39 }
  0x55   : > { %486 = vmatprep.mubr.bf16.mxu0 %v1391_v2 }
  0x5c   : > { %1099 = vmatmul.mubr.msk.bf16.gmra.mxu0 %vm335_vm0, %v266_v42 }
  0x5d   : > { %496 = vmatprep.mubr.bf16.mxu0 %v1391_v2 }
  0x64   : > { %1100 = vmatmul.mubr.msk.bf16.gmra.mxu0 %vm335_vm0, %v267_v45 }
  0x65   : > { %506 = vmatprep.mubr.bf16.mxu0 %v1391_v2 }
  0x6c   : > { %1101 = vmatmul.mubr.msk.bf16.gmra.mxu0 %vm335_vm0, %v268_v50 }
  0x6d   : > { %516 = vmatprep.mubr.bf16.mxu0 %v1391_v2 }
  0x74   : > { %1102 = vmatmul.mubr.msk.bf16.gmra.mxu0 %vm335_vm0, %v269_v57 }
  0x75   : > { %526 = vmatprep.mubr.bf16.mxu0 %v1391_v2 }
  0x7c   : > { %1103 = vmatmul.mubr.msk.bf16.gmra.mxu0 %vm335_vm0, %v270_v60 }
  0x7d   : > { %536 = vmatprep.mubr.bf16.mxu0 %v1391_v2 }
  0x84   : > { %1104 = vmatmul.mubr.msk.bf16.gmra.mxu0 %vm335_vm0, %v271_v63 }
  0x85   : > { %546 = vmatprep.mubr.bf16.mxu0 %v1391_v2 }
  0x8c   : > { %1105 = vmatmul.mubr.msk.bf16.gmra.mxu0 %vm335_vm0, %v272_v3 }
  0x8d   : > { %556 = vmatprep.mubr.bf16.mxu0 %v1391_v2 }
  0x94   : > { %1106 = vmatmul.mubr.msk.bf16.gmra.mxu0 %vm335_vm0, %v273_v6 }
  0x95   : > { %566 = vmatprep.mubr.bf16.mxu0 %v1391_v2 }
  0x9c   : > { %1107 = vmatmul.mubr.msk.bf16.gmra.mxu0 %vm335_vm0, %v274_v9 }
  0xe4   : > { %v418_v15 = vpop.f32.mrf.mxu0 }
  0xe5   : > { %v419_v21 = vadd.f32 %v418_v15, %v1620_v17 }
  0xe6   : > { %v420_v18 = vpop.f32.mrf.mxu0 }
  0xe7   : > { %v421_v19 = vadd.f32 %v420_v18, %v1618_v16  ;;  %v577_v28 = vmax.f32 %v419_v21, 0.0 }
  0xe8   : > { %v422_v2 = vpop.f32.mrf.mxu0 }
  0xe9   : > { %v423_v20 = vadd.f32 %v422_v2, %v1620_v17  ;;  %v578_v26 = vmax.f32 %v421_v19, 0.0 }
  0xea   : > { %v424_v22 = vpop.f32.mrf.mxu0 }
  0xeb   : > { %v425_v23 = vadd.f32 %v424_v22, %v1618_v16  ;;  %v579_v24 = vmax.f32 %v423_v20, 0.0 }
  0xec   : > { %v428_v25 = vpop.f32.mrf.mxu0 }
  0xed   : > { %v580_v27 = vmax.f32 %v425_v23, 0.0  ;;  %v641_v31 = vpack.c.bf16 %v579_v24, %v577_v28  ;;  %v429_v35 = vadd.f32 %v428_v25, %v1620_v17 }
  0xee   : > { %v430_v29 = vpop.f32.mrf.mxu0 }
  0xef   : > { %v642_v30 = vpack.c.bf16 %v580_v27, %v578_v26  ;;  %v431_v33 = vadd.f32 %v430_v29, %v1618_v16  ;;  %v581_v42 = vmax.f32 %v429_v35, 0.0 }
  0xf0   : > { %v432_v32 = vpop.f32.mrf.mxu0 }
  0xf1   : > { %v433_v34 = vadd.f32 %v432_v32, %v1620_v17  ;;  %840 = vmatprep.mubr.bf16.mxu0 %v642_v30  ;;  %v582_v40 = vmax.f32 %v431_v33, 0.0 }
  0xf2   : > { %v434_v36 = vpop.f32.mrf.mxu0  ;;  %841 = vmatmul.mubr.bf16.vlgmr.msra.gmra.mxu0 %v641_v31 }
  0xf3   : > { %v435_v37 = vadd.f32 %v434_v36, %v1618_v16  ;;  %v583_v38 = vmax.f32 %v433_v34, 0.0 }
  0xf4   : > { %v438_v39 = vpop.f32.mrf.mxu0 }
  0xf5   : > { %v584_v41 = vmax.f32 %v435_v37, 0.0  ;;  %v643_v45 = vpack.c.bf16 %v583_v38, %v581_v42  ;;  %v439_v49 = vadd.f32 %v438_v39, %v1620_v17 }
  0xf6   : > { %v440_v43 = vpop.f32.mrf.mxu0 }
  0xf7   : > { %v644_v44 = vpack.c.bf16 %v584_v41, %v582_v40  ;;  %v441_v47 = vadd.f32 %v440_v43, %v1618_v16  ;;  %v585_v56 = vmax.f32 %v439_v49, 0.0 }
  0xf8   : > { %v442_v46 = vpop.f32.mrf.mxu0 }
  0xf9   : > { %v443_v48 = vadd.f32 %v442_v46, %v1620_v17  ;;  %848 = vmatprep.mubr.bf16.mxu1 %v644_v44  ;;  %v586_v54 = vmax.f32 %v441_v47, 0.0 }
  0xfa   : > { %v444_v50 = vpop.f32.mrf.mxu0  ;;  %849 = vmatmul.mubr.bf16.vlgmr.msra.gmra.mxu1 %v643_v45 }
  0xfb   : > { %v445_v51 = vadd.f32 %v444_v50, %v1618_v16  ;;  %v587_v52 = vmax.f32 %v443_v48, 0.0 }
  0xfc   : > { %v448_v53 = vpop.f32.mrf.mxu0 }
  0xfd   : > { %v588_v55 = vmax.f32 %v445_v51, 0.0  ;;  %v645_v59 = vpack.c.bf16 %v587_v52, %v585_v56  ;;  %v449_v63 = vadd.f32 %v448_v53, %v1620_v17 }
  0xfe   : > { %v450_v57 = vpop.f32.mrf.mxu0 }
  0xff   : > { %v646_v58 = vpack.c.bf16 %v588_v55, %v586_v54  ;;  %v451_v61 = vadd.f32 %v450_v57, %v1618_v16  ;;  %v589_v7 = vmax.f32 %v449_v63, 0.0 }
 0x100   : > { %v452_v60 = vpop.f32.mrf.mxu0 }
 0x101   : > { %v453_v62 = vadd.f32 %v452_v60, %v1620_v17  ;;  %856 = vmatprep.mubr.bf16.mxu1 %v646_v58  ;;  %v590_v5 = vmax.f32 %v451_v61, 0.0 }
 0x102   : > { %v454_v0 = vpop.f32.mrf.mxu0  ;;  %857 = vmatmul.mubr.bf16.gmra.mxu1 %v645_v59 }
 0x103   : > { %v455_v1 = vadd.f32 %v454_v0, %v1618_v16  ;;  %v591_v3 = vmax.f32 %v453_v62, 0.0 }
 0x104   : > { %v458_v4 = vpop.f32.mrf.mxu0 }
 0x105   : > { %v592_v6 = vmax.f32 %v455_v1, 0.0  ;;  %v647_v10 = vpack.c.bf16 %v591_v3, %v589_v7  ;;  %v459_v14 = vadd.f32 %v458_v4, %v1620_v17 }
 0x106   : > { %v460_v8 = vpop.f32.mrf.mxu0 }
 0x107   : > { %v648_v9 = vpack.c.bf16 %v592_v6, %v590_v5  ;;  %v461_v12 = vadd.f32 %v460_v8, %v1618_v16  ;;  %v593_v22 = vmax.f32 %v459_v14, 0.0 }
 0x108   : > { %v462_v11 = vpop.f32.mrf.mxu0 }
 0x109   : > { %v463_v13 = vadd.f32 %v462_v11, %v1620_v17  ;;  %864 = vmatprep.mubr.bf16.mxu1 %v648_v9  ;;  %v594_v20 = vmax.f32 %v461_v12, 0.0 }
 0x10a   : > { %v464_v15 = vpop.f32.mrf.mxu0  ;;  %865 = vmatmul.mubr.bf16.gmra.mxu1 %v647_v10 }
 0x10b   : > { %v465_v18 = vadd.f32 %v464_v15, %v1618_v16  ;;  %v595_v2 = vmax.f32 %v463_v13, 0.0 }
 0x10c   : > { %v468_v19 = vpop.f32.mrf.mxu0 }
 0x10d   : > { %v596_v21 = vmax.f32 %v465_v18, 0.0  ;;  %v649_v25 = vpack.c.bf16 %v595_v2, %v593_v22  ;;  %v469_v29 = vadd.f32 %v468_v19, %v1620_v17 }
 0x10e   : > { %v470_v23 = vpop.f32.mrf.mxu0 }
 0x10f   : > { %v650_v24 = vpack.c.bf16 %v596_v21, %v594_v20  ;;  %v471_v27 = vadd.f32 %v470_v23, %v1618_v16  ;;  %v597_v36 = vmax.f32 %v469_v29, 0.0 }
 0x110   : > { %v472_v26 = vpop.f32.mrf.mxu0 }
 0x111   : > { %v473_v28 = vadd.f32 %v472_v26, %v1620_v17  ;;  %872 = vmatprep.mubr.bf16.mxu1 %v650_v24  ;;  %v598_v34 = vmax.f32 %v471_v27, 0.0 }
 0x112   : > { %v474_v30 = vpop.f32.mrf.mxu0  ;;  %873 = vmatmul.mubr.bf16.gmra.mxu1 %v649_v25 }
 0x113   : > { %v475_v31 = vadd.f32 %v474_v30, %v1618_v16  ;;  %v599_v32 = vmax.f32 %v473_v28, 0.0 }
 0x114   : > { %v478_v33 = vpop.f32.mrf.mxu0 }
 0x115   : > { %v600_v35 = vmax.f32 %v475_v31, 0.0  ;;  %v651_v39 = vpack.c.bf16 %v599_v32, %v597_v36  ;;  %v479_v43 = vadd.f32 %v478_v33, %v1620_v17 }
 0x116   : > { %v480_v37 = vpop.f32.mrf.mxu0 }
 0x117   : > { %v652_v38 = vpack.c.bf16 %v600_v35, %v598_v34  ;;  %v481_v41 = vadd.f32 %v480_v37, %v1618_v16  ;;  %v601_v50 = vmax.f32 %v479_v43, 0.0 }
 0x118   : > { %v482_v40 = vpop.f32.mrf.mxu0 }
 0x119   : > { %v483_v42 = vadd.f32 %v482_v40, %v1620_v17  ;;  %880 = vmatprep.mubr.bf16.mxu1 %v652_v38  ;;  %v602_v48 = vmax.f32 %v481_v41, 0.0 }
 0x11a   : > { %v484_v44 = vpop.f32.mrf.mxu0  ;;  %881 = vmatmul.mubr.bf16.gmra.mxu1 %v651_v39 }
 0x11b   : > { %v485_v45 = vadd.f32 %v484_v44, %v1618_v16  ;;  %v603_v46 = vmax.f32 %v483_v42, 0.0 }
 0x11c   : > { %v488_v47 = vpop.f32.mrf.mxu0 }
 0x11d   : > { %v604_v49 = vmax.f32 %v485_v45, 0.0  ;;  %v653_v53 = vpack.c.bf16 %v603_v46, %v601_v50  ;;  %v489_v57 = vadd.f32 %v488_v47, %v1620_v17 }
 0x11e   : > { %v490_v51 = vpop.f32.mrf.mxu0 }
 0x11f   : > { %v654_v52 = vpack.c.bf16 %v604_v49, %v602_v48  ;;  %v491_v55 = vadd.f32 %v490_v51, %v1618_v16  ;;  %v605_v0 = vmax.f32 %v489_v57, 0.0 }
 0x120   : > { %v492_v54 = vpop.f32.mrf.mxu0 }
 0x121   : > { %v493_v56 = vadd.f32 %v492_v54, %v1620_v17  ;;  %888 = vmatprep.mubr.bf16.mxu1 %v654_v52  ;;  %v606_v62 = vmax.f32 %v491_v55, 0.0 }
 0x122   : > { %v494_v58 = vpop.f32.mrf.mxu0  ;;  %889 = vmatmul.mubr.bf16.gmra.mxu1 %v653_v53 }
 0x123   : > { %v495_v59 = vadd.f32 %v494_v58, %v1618_v16  ;;  %v607_v60 = vmax.f32 %v493_v56, 0.0 }
 0x124   : > { %v498_v61 = vpop.f32.mrf.mxu0 }
 0x125   : > { %v608_v63 = vmax.f32 %v495_v59, 0.0  ;;  %v655_v4 = vpack.c.bf16 %v607_v60, %v605_v0  ;;  %v499_v8 = vadd.f32 %v498_v61, %v1620_v17 }
 0x126   : > { %v500_v1 = vpop.f32.mrf.mxu0 }
 0x127   : > { %v656_v3 = vpack.c.bf16 %v608_v63, %v606_v62  ;;  %v501_v6 = vadd.f32 %v500_v1, %v1618_v16  ;;  %v609_v15 = vmax.f32 %v499_v8, 0.0 }
 0x128   : > { %v502_v5 = vpop.f32.mrf.mxu0 }
 0x129   : > { %v503_v7 = vadd.f32 %v502_v5, %v1620_v17  ;;  %896 = vmatprep.mubr.bf16.mxu1 %v656_v3  ;;  %v610_v13 = vmax.f32 %v501_v6, 0.0 }
 0x12a   : > { %v504_v9 = vpop.f32.mrf.mxu0  ;;  %897 = vmatmul.mubr.bf16.gmra.mxu1 %v655_v4 }
 0x12b   : > { %v505_v10 = vadd.f32 %v504_v9, %v1618_v16  ;;  %v611_v11 = vmax.f32 %v503_v7, 0.0 }
 0x12c   : > { %v508_v12 = vpop.f32.mrf.mxu0 }
 0x12d   : > { %v612_v14 = vmax.f32 %v505_v10, 0.0  ;;  %v657_v19 = vpack.c.bf16 %v611_v11, %v609_v15  ;;  %v509_v23 = vadd.f32 %v508_v12, %v1620_v17 }
 0x12e   : > { %v510_v18 = vpop.f32.mrf.mxu0 }
 0x12f   : > { %v658_v2 = vpack.c.bf16 %v612_v14, %v610_v13  ;;  %v511_v21 = vadd.f32 %v510_v18, %v1618_v16  ;;  %v613_v30 = vmax.f32 %v509_v23, 0.0 }
 0x130   : > { %v512_v20 = vpop.f32.mrf.mxu0 }
 0x131   : > { %v513_v22 = vadd.f32 %v512_v20, %v1620_v17  ;;  %904 = vmatprep.mubr.bf16.mxu1 %v658_v2  ;;  %v614_v28 = vmax.f32 %v511_v21, 0.0 }
 0x132   : > { %v514_v24 = vpop.f32.mrf.mxu0  ;;  %905 = vmatmul.mubr.bf16.gmra.mxu1 %v657_v19 }
 0x133   : > { %v515_v25 = vadd.f32 %v514_v24, %v1618_v16  ;;  %v615_v26 = vmax.f32 %v513_v22, 0.0 }
 0x134   : > { %v518_v27 = vpop.f32.mrf.mxu0 }
 0x135   : > { %v616_v29 = vmax.f32 %v515_v25, 0.0  ;;  %v659_v33 = vpack.c.bf16 %v615_v26, %v613_v30  ;;  %v519_v37 = vadd.f32 %v518_v27, %v1620_v17 }
 0x136   : > { %v520_v31 = vpop.f32.mrf.mxu0 }
 0x137   : > { %v660_v32 = vpack.c.bf16 %v616_v29, %v614_v28  ;;  %v521_v35 = vadd.f32 %v520_v31, %v1618_v16  ;;  %v617_v44 = vmax.f32 %v519_v37, 0.0 }
 0x138   : > { %v522_v34 = vpop.f32.mrf.mxu0 }
 0x139   : > { %v523_v36 = vadd.f32 %v522_v34, %v1620_v17  ;;  %912 = vmatprep.mubr.bf16.mxu1 %v660_v32  ;;  %v618_v42 = vmax.f32 %v521_v35, 0.0 }
 0x13a   : > { %v524_v38 = vpop.f32.mrf.mxu0  ;;  %913 = vmatmul.mubr.bf16.gmra.mxu1 %v659_v33 }
 0x13b   : > { %v525_v39 = vadd.f32 %v524_v38, %v1618_v16  ;;  %v619_v40 = vmax.f32 %v523_v36, 0.0 }
 0x13c   : > { %v528_v41 = vpop.f32.mrf.mxu0 }
 0x13d   : > { %v620_v43 = vmax.f32 %v525_v39, 0.0  ;;  %v661_v47 = vpack.c.bf16 %v619_v40, %v617_v44  ;;  %v529_v51 = vadd.f32 %v528_v41, %v1620_v17 }
 0x13e   : > { %v530_v45 = vpop.f32.mrf.mxu0 }
 0x13f   : > { %v662_v46 = vpack.c.bf16 %v620_v43, %v618_v42  ;;  %v531_v49 = vadd.f32 %v530_v45, %v1618_v16  ;;  %v621_v58 = vmax.f32 %v529_v51, 0.0 }
 0x140   : > { %v532_v48 = vpop.f32.mrf.mxu0 }
 0x141   : > { %v533_v50 = vadd.f32 %v532_v48, %v1620_v17  ;;  %920 = vmatprep.mubr.bf16.mxu1 %v662_v46  ;;  %v622_v56 = vmax.f32 %v531_v49, 0.0 }
 0x142   : > { %v534_v52 = vpop.f32.mrf.mxu0  ;;  %921 = vmatmul.mubr.bf16.gmra.mxu1 %v661_v47 }
 0x143   : > { %v535_v53 = vadd.f32 %v534_v52, %v1618_v16  ;;  %v623_v54 = vmax.f32 %v533_v50, 0.0 }
 0x144   : > { %v538_v55 = vpop.f32.mrf.mxu0 }
 0x145   : > { %v624_v57 = vmax.f32 %v535_v53, 0.0  ;;  %v663_v61 = vpack.c.bf16 %v623_v54, %v621_v58  ;;  %v539_v1 = vadd.f32 %v538_v55, %v1620_v17 }
 0x146   : > { %v540_v59 = vpop.f32.mrf.mxu0 }
 0x147   : > { %v664_v60 = vpack.c.bf16 %v624_v57, %v622_v56  ;;  %v541_v63 = vadd.f32 %v540_v59, %v1618_v16  ;;  %v625_v9 = vmax.f32 %v539_v1, 0.0 }
 0x148   : > { %v542_v62 = vpop.f32.mrf.mxu0 }
 0x149   : > { %v543_v0 = vadd.f32 %v542_v62, %v1620_v17  ;;  %928 = vmatprep.mubr.bf16.mxu1 %v664_v60  ;;  %v626_v7 = vmax.f32 %v541_v63, 0.0 }
 0x14a   : > { %v544_v3 = vpop.f32.mrf.mxu0  ;;  %929 = vmatmul.mubr.bf16.gmra.mxu1 %v663_v61 }
 0x14b   : > { %v545_v4 = vadd.f32 %v544_v3, %v1618_v16  ;;  %v627_v5 = vmax.f32 %v543_v0, 0.0 }
 0x14c   : > { %v548_v6 = vpop.f32.mrf.mxu0 }
 0x14d   : > { %v628_v8 = vmax.f32 %v545_v4, 0.0  ;;  %v665_v12 = vpack.c.bf16 %v627_v5, %v625_v9  ;;  %v549_v18 = vadd.f32 %v548_v6, %v1620_v17 }
 0x14e   : > { %v550_v10 = vpop.f32.mrf.mxu0 }
 0x14f   : > { %v666_v11 = vpack.c.bf16 %v628_v8, %v626_v7  ;;  %v551_v14 = vadd.f32 %v550_v10, %v1618_v16  ;;  %v629_v24 = vmax.f32 %v549_v18, 0.0 }
 0x150   : > { %v552_v13 = vpop.f32.mrf.mxu0 }
 0x151   : > { %v553_v15 = vadd.f32 %v552_v13, %v1620_v17  ;;  %936 = vmatprep.mubr.bf16.mxu1 %v666_v11  ;;  %v630_v22 = vmax.f32 %v551_v14, 0.0 }
 0x152   : > { %v554_v2 = vpop.f32.mrf.mxu0  ;;  %937 = vmatmul.mubr.bf16.gmra.mxu1 %v665_v12 }
 0x153   : > { %v555_v19 = vadd.f32 %v554_v2, %v1618_v16  ;;  %v631_v20 = vmax.f32 %v553_v15, 0.0 }
 0x154   : > { %v558_v21 = vpop.f32.mrf.mxu0 }
 0x155   : > { %v632_v23 = vmax.f32 %v555_v19, 0.0  ;;  %v667_v27 = vpack.c.bf16 %v631_v20, %v629_v24  ;;  %v559_v31 = vadd.f32 %v558_v21, %v1620_v17 }
 0x156   : > { %v560_v25 = vpop.f32.mrf.mxu0 }
 0x157   : > { %v668_v26 = vpack.c.bf16 %v632_v23, %v630_v22  ;;  %v561_v29 = vadd.f32 %v560_v25, %v1618_v16  ;;  %v633_v38 = vmax.f32 %v559_v31, 0.0 }
 0x158   : > { %v562_v28 = vpop.f32.mrf.mxu0 }
 0x159   : > { %v563_v30 = vadd.f32 %v562_v28, %v1620_v17  ;;  %944 = vmatprep.mubr.bf16.mxu1 %v668_v26  ;;  %v634_v36 = vmax.f32 %v561_v29, 0.0 }
 0x15a   : > { %v564_v32 = vpop.f32.mrf.mxu0  ;;  %945 = vmatmul.mubr.bf16.gmra.mxu1 %v667_v27 }
 0x15b   : > { %v565_v33 = vadd.f32 %v564_v32, %v1618_v16  ;;  %v635_v34 = vmax.f32 %v563_v30, 0.0 }
 0x15c   : > { %v568_v35 = vpop.f32.mrf.mxu0 }
 0x15d   : > { %v636_v37 = vmax.f32 %v565_v33, 0.0  ;;  %v669_v41 = vpack.c.bf16 %v635_v34, %v633_v38  ;;  %v569_v45 = vadd.f32 %v568_v35, %v1620_v17 }
 0x15e   : > { %v570_v39 = vpop.f32.mrf.mxu0 }
 0x15f   : > { %v670_v40 = vpack.c.bf16 %v636_v37, %v634_v36  ;;  %v571_v43 = vadd.f32 %v570_v39, %v1618_v16  ;;  %v637_v51 = vmax.f32 %v569_v45, 0.0 }
 0x160   : > { %v572_v42 = vpop.f32.mrf.mxu0 }
 0x161   : > { %v573_v44 = vadd.f32 %v572_v42, %v1620_v17  ;;  %952 = vmatprep.mubr.bf16.mxu1 %v670_v40  ;;  %v638_v49 = vmax.f32 %v571_v43, 0.0  ;;  %v1692_v17 = vld [vmem:[%s1815_s4] ss:$0 sm:$0xff] }
 0x162   : > { %v574_v46 = vpop.f32.mrf.mxu0  ;;  %953 = vmatmul.mubr.bf16.gmra.mxu1 %v669_v41 }
 0x163   : > { %v575_v47 = vadd.f32 %v574_v46, %v1618_v16  ;;  %v639_v48 = vmax.f32 %v573_v44, 0.0 }
 0x165   : > { %v640_v50 = vmax.f32 %v575_v47, 0.0  ;;  %v671_v53 = vpack.c.bf16 %v639_v48, %v637_v51 }
 0x167   : > { %v672_v52 = vpack.c.bf16 %v640_v50, %v638_v49 }
 0x169   : > { %960 = vmatprep.mubr.bf16.mxu1 %v672_v52 }
 0x16a   : > { %961 = vmatmul.mubr.bf16.gmra.mxu1 %v671_v53 }
 0x1b2   : > { %v1147_v54 = vpop.f32.mrf.mxu0 }
 0x1b4   : > { %v1148_v55 = vpop.f32.mrf.mxu0 }
 0x1b5   : > { %v1149_v56 = vadd.f32 %v1148_v55, %v1147_v54 }
 0x1b6   : > { %v1150_v16 = vpop.f32.mrf.mxu0 }
 0x1b7   : > { %v843_v57 = vadd.f32 %v1149_v56, %v1692_v17 }
 0x1b8   : > { %v1151_v58 = vpop.f32.mrf.mxu0 }
 0x1b9   : > { %969 = vst [vmem:[%s1695_s17] sm:$0xff] %v843_v57  ;;  %v1152_v59 = vadd.f32 %v1151_v58, %v1150_v16 }
 0x1ba   : > { %v1153_v60 = vpop.f32.mrf.mxu1 }
 0x1bb   : > { %v846_v61 = vadd.f32 %v1152_v59, %v1692_v17 }
 0x1bc   : > { %v1154_v62 = vpop.f32.mrf.mxu1 }
 0x1bd   : > { %970 = vst [vmem:[%s1695_s17 + $0x8] sm:$0xff] %v846_v61  ;;  %v1155_v63 = vadd.f32 %v1154_v62, %v1153_v60 }
 0x1be   : > { %v1156_v0 = vpop.f32.mrf.mxu1 }
 0x1bf   : > { %v851_v1 = vadd.f32 %v1155_v63, %v1692_v17 }
 0x1c0   : > { %v1157_v3 = vpop.f32.mrf.mxu1 }
 0x1c1   : > { %971 = vst [vmem:[%s1695_s17 + $0x10] sm:$0xff] %v851_v1  ;;  %v1158_v4 = vadd.f32 %v1157_v3, %v1156_v0 }
 0x1c2   : > { %v1159_v5 = vpop.f32.mrf.mxu1 }
 0x1c3   : > { %v854_v6 = vadd.f32 %v1158_v4, %v1692_v17 }
 0x1c4   : > { %v1160_v7 = vpop.f32.mrf.mxu1 }
 0x1c5   : > { %972 = vst [vmem:[%s1695_s17 + $0x18] sm:$0xff] %v854_v6  ;;  %v1161_v8 = vadd.f32 %v1160_v7, %v1159_v5 }
 0x1c6   : > { %v1162_v9 = vpop.f32.mrf.mxu1 }
 0x1c7   : > { %v859_v10 = vadd.f32 %v1161_v8, %v1692_v17 }
 0x1c8   : > { %v1163_v11 = vpop.f32.mrf.mxu1 }
 0x1c9   : > { %973 = vst [vmem:[%s1695_s17 + $0x20] sm:$0xff] %v859_v10  ;;  %v1164_v12 = vadd.f32 %v1163_v11, %v1162_v9 }
 0x1ca   : > { %v1165_v13 = vpop.f32.mrf.mxu1 }
 0x1cb   : > { %v862_v14 = vadd.f32 %v1164_v12, %v1692_v17 }
 0x1cc   : > { %v1166_v15 = vpop.f32.mrf.mxu1 }
 0x1cd   : > { %974 = vst [vmem:[%s1695_s17 + $0x28] sm:$0xff] %v862_v14  ;;  %v1167_v18 = vadd.f32 %v1166_v15, %v1165_v13 }
 0x1ce   : > { %v1168_v2 = vpop.f32.mrf.mxu1 }
 0x1cf   : > { %v867_v19 = vadd.f32 %v1167_v18, %v1692_v17 }
 0x1d0   : > { %v1169_v20 = vpop.f32.mrf.mxu1 }
 0x1d1   : > { %975 = vst [vmem:[%s1695_s17 + $0x30] sm:$0xff] %v867_v19  ;;  %v1170_v21 = vadd.f32 %v1169_v20, %v1168_v2 }
 0x1d2   : > { %v1171_v22 = vpop.f32.mrf.mxu1 }
 0x1d3   : > { %v870_v23 = vadd.f32 %v1170_v21, %v1692_v17 }
 0x1d4   : > { %v1172_v24 = vpop.f32.mrf.mxu1 }
 0x1d5   : > { %976 = vst [vmem:[%s1695_s17 + $0x38] sm:$0xff] %v870_v23  ;;  %v1173_v25 = vadd.f32 %v1172_v24, %v1171_v22 }
 0x1d6   : > { %v1174_v26 = vpop.f32.mrf.mxu1 }
 0x1d7   : > { %v875_v27 = vadd.f32 %v1173_v25, %v1692_v17 }
 0x1d8   : > { %v1175_v28 = vpop.f32.mrf.mxu1 }
 0x1d9   : > { %977 = vst [vmem:[%s1695_s17 + $0x40] sm:$0xff] %v875_v27  ;;  %v1176_v29 = vadd.f32 %v1175_v28, %v1174_v26 }
 0x1da   : > { %v1177_v30 = vpop.f32.mrf.mxu1 }
 0x1db   : > { %v878_v31 = vadd.f32 %v1176_v29, %v1692_v17 }
 0x1dc   : > { %v1178_v32 = vpop.f32.mrf.mxu1 }
 0x1dd   : > { %978 = vst [vmem:[%s1695_s17 + $0x48] sm:$0xff] %v878_v31  ;;  %v1179_v33 = vadd.f32 %v1178_v32, %v1177_v30 }
 0x1de   : > { %v1180_v34 = vpop.f32.mrf.mxu1 }
 0x1df   : > { %v883_v35 = vadd.f32 %v1179_v33, %v1692_v17 }
 0x1e0   : > { %v1181_v36 = vpop.f32.mrf.mxu1 }
 0x1e1   : > { %979 = vst [vmem:[%s1695_s17 + $0x50] sm:$0xff] %v883_v35  ;;  %v1182_v37 = vadd.f32 %v1181_v36, %v1180_v34 }
 0x1e2   : > { %v1183_v38 = vpop.f32.mrf.mxu1 }
 0x1e3   : > { %v886_v39 = vadd.f32 %v1182_v37, %v1692_v17 }
 0x1e4   : > { %v1184_v40 = vpop.f32.mrf.mxu1 }
 0x1e5   : > { %980 = vst [vmem:[%s1695_s17 + $0x58] sm:$0xff] %v886_v39  ;;  %v1185_v41 = vadd.f32 %v1184_v40, %v1183_v38 }
 0x1e6   : > { %v1186_v42 = vpop.f32.mrf.mxu1 }
 0x1e7   : > { %v891_v43 = vadd.f32 %v1185_v41, %v1692_v17 }
 0x1e8   : > { %v1187_v44 = vpop.f32.mrf.mxu1 }
 0x1e9   : > { %981 = vst [vmem:[%s1695_s17 + $0x60] sm:$0xff] %v891_v43  ;;  %v1188_v45 = vadd.f32 %v1187_v44, %v1186_v42 }
 0x1ea   : > { %v1189_v46 = vpop.f32.mrf.mxu1 }
 0x1eb   : > { %v894_v47 = vadd.f32 %v1188_v45, %v1692_v17 }
 0x1ec   : > { %v1190_v48 = vpop.f32.mrf.mxu1 }
 0x1ed   : > { %982 = vst [vmem:[%s1695_s17 + $0x68] sm:$0xff] %v894_v47  ;;  %v1191_v49 = vadd.f32 %v1190_v48, %v1189_v46 }
 0x1ee   : > { %v1192_v50 = vpop.f32.mrf.mxu1 }
 0x1ef   : > { %v899_v51 = vadd.f32 %v1191_v49, %v1692_v17 }
 0x1f0   : > { %v1193_v52 = vpop.f32.mrf.mxu1 }
 0x1f1   : > { %983 = vst [vmem:[%s1695_s17 + $0x70] sm:$0xff] %v899_v51  ;;  %v1194_v53 = vadd.f32 %v1193_v52, %v1192_v50 }
 0x1f2   : > { %v1195_v54 = vpop.f32.mrf.mxu1 }
 0x1f3   : > { %v902_v55 = vadd.f32 %v1194_v53, %v1692_v17 }
 0x1f4   : > { %v1196_v56 = vpop.f32.mrf.mxu1 }
 0x1f5   : > { %984 = vst [vmem:[%s1695_s17 + $0x78] sm:$0xff] %v902_v55  ;;  %v1197_v16 = vadd.f32 %v1196_v56, %v1195_v54 }
 0x1f6   : > { %v1198_v57 = vpop.f32.mrf.mxu1 }
 0x1f7   : > { %v907_v58 = vadd.f32 %v1197_v16, %v1692_v17 }
 0x1f8   : > { %v1199_v59 = vpop.f32.mrf.mxu1 }
 0x1f9   : > { %985 = vst [vmem:[%s1695_s17 + $0x80] sm:$0xff] %v907_v58  ;;  %v1200_v60 = vadd.f32 %v1199_v59, %v1198_v57 }
 0x1fa   : > { %v1201_v61 = vpop.f32.mrf.mxu1 }
 0x1fb   : > { %v910_v62 = vadd.f32 %v1200_v60, %v1692_v17 }
 0x1fc   : > { %v1202_v63 = vpop.f32.mrf.mxu1 }
 0x1fd   : > { %986 = vst [vmem:[%s1695_s17 + $0x88] sm:$0xff] %v910_v62  ;;  %v1203_v0 = vadd.f32 %v1202_v63, %v1201_v61 }
 0x1fe   : > { %v1204_v1 = vpop.f32.mrf.mxu1 }
 0x1ff   : > { %v915_v3 = vadd.f32 %v1203_v0, %v1692_v17 }
 0x200   : > { %v1205_v4 = vpop.f32.mrf.mxu1 }
 0x201   : > { %987 = vst [vmem:[%s1695_s17 + $0x90] sm:$0xff] %v915_v3  ;;  %v1206_v5 = vadd.f32 %v1205_v4, %v1204_v1 }
 0x202   : > { %v1207_v6 = vpop.f32.mrf.mxu1 }
 0x203   : > { %v918_v7 = vadd.f32 %v1206_v5, %v1692_v17 }
 0x204   : > { %v1208_v8 = vpop.f32.mrf.mxu1 }
 0x205   : > { %988 = vst [vmem:[%s1695_s17 + $0x98] sm:$0xff] %v918_v7  ;;  %v1209_v9 = vadd.f32 %v1208_v8, %v1207_v6 }
 0x206   : > { %v1210_v10 = vpop.f32.mrf.mxu1 }
 0x207   : > { %v923_v11 = vadd.f32 %v1209_v9, %v1692_v17 }
 0x208   : > { %v1211_v12 = vpop.f32.mrf.mxu1 }
 0x209   : > { %989 = vst [vmem:[%s1695_s17 + $0xa0] sm:$0xff] %v923_v11  ;;  %v1212_v13 = vadd.f32 %v1211_v12, %v1210_v10 }
 0x20a   : > { %v1213_v14 = vpop.f32.mrf.mxu1 }
 0x20b   : > { %v926_v15 = vadd.f32 %v1212_v13, %v1692_v17 }
 0x20c   : > { %v1214_v18 = vpop.f32.mrf.mxu1 }
 0x20d   : > { %990 = vst [vmem:[%s1695_s17 + $0xa8] sm:$0xff] %v926_v15  ;;  %v1215_v2 = vadd.f32 %v1214_v18, %v1213_v14 }
 0x20e   : > { %v1216_v19 = vpop.f32.mrf.mxu1 }
 0x20f   : > { %v931_v20 = vadd.f32 %v1215_v2, %v1692_v17 }
 0x210   : > { %v1217_v21 = vpop.f32.mrf.mxu1 }
 0x211   : > { %991 = vst [vmem:[%s1695_s17 + $0xb0] sm:$0xff] %v931_v20  ;;  %v1218_v22 = vadd.f32 %v1217_v21, %v1216_v19 }
 0x212   : > { %v1219_v23 = vpop.f32.mrf.mxu1 }
 0x213   : > { %v934_v24 = vadd.f32 %v1218_v22, %v1692_v17 }
 0x214   : > { %v1220_v25 = vpop.f32.mrf.mxu1 }
 0x215   : > { %992 = vst [vmem:[%s1695_s17 + $0xb8] sm:$0xff] %v934_v24  ;;  %v1221_v26 = vadd.f32 %v1220_v25, %v1219_v23 }
 0x216   : > { %v1222_v27 = vpop.f32.mrf.mxu1 }
 0x217   : > { %v939_v28 = vadd.f32 %v1221_v26, %v1692_v17 }
 0x218   : > { %v1223_v29 = vpop.f32.mrf.mxu1 }
 0x219   : > { %993 = vst [vmem:[%s1695_s17 + $0xc0] sm:$0xff] %v939_v28  ;;  %v1224_v30 = vadd.f32 %v1223_v29, %v1222_v27 }
 0x21a   : > { %v1225_v31 = vpop.f32.mrf.mxu1 }
 0x21b   : > { %v942_v32 = vadd.f32 %v1224_v30, %v1692_v17 }
 0x21c   : > { %v1226_v33 = vpop.f32.mrf.mxu1 }
 0x21d   : > { %994 = vst [vmem:[%s1695_s17 + $0xc8] sm:$0xff] %v942_v32  ;;  %v1227_v34 = vadd.f32 %v1226_v33, %v1225_v31 }
 0x21e   : > { %v1228_v35 = vpop.f32.mrf.mxu1 }
 0x21f   : > { %v947_v36 = vadd.f32 %v1227_v34, %v1692_v17 }
 0x220   : > { %v1229_v37 = vpop.f32.mrf.mxu1 }
 0x221   : > { %995 = vst [vmem:[%s1695_s17 + $0xd0] sm:$0xff] %v947_v36  ;;  %v1230_v38 = vadd.f32 %v1229_v37, %v1228_v35 }
 0x222   : > { %v1231_v39 = vpop.f32.mrf.mxu1 }
 0x223   : > { %v950_v40 = vadd.f32 %v1230_v38, %v1692_v17 }
 0x224   : > { %v1232_v41 = vpop.f32.mrf.mxu1 }
 0x225   : > { %996 = vst [vmem:[%s1695_s17 + $0xd8] sm:$0xff] %v950_v40  ;;  %v1233_v42 = vadd.f32 %v1232_v41, %v1231_v39 }
 0x226   : > { %v1234_v43 = vpop.f32.mrf.mxu1 }
 0x227   : > { %v955_v44 = vadd.f32 %v1233_v42, %v1692_v17 }
 0x228   : > { %v1235_v45 = vpop.f32.mrf.mxu1 }
 0x229   : > { %997 = vst [vmem:[%s1695_s17 + $0xe0] sm:$0xff] %v955_v44  ;;  %v1236_v46 = vadd.f32 %v1235_v45, %v1234_v43 }
 0x22a   : > { %v1237_v47 = vpop.f32.mrf.mxu1 }
 0x22b   : > { %v958_v48 = vadd.f32 %v1236_v46, %v1692_v17 }
 0x22c   : > { %v1238_v49 = vpop.f32.mrf.mxu1 }
 0x22d   : > { %998 = vst [vmem:[%s1695_s17 + $0xe8] sm:$0xff] %v958_v48  ;;  %v1239_v50 = vadd.f32 %v1238_v49, %v1237_v47 }
 0x22e   : > { %v1240_v51 = vpop.f32.mrf.mxu1 }
 0x22f   : > { %v963_v52 = vadd.f32 %v1239_v50, %v1692_v17 }
 0x230   : > { %v1241_v53 = vpop.f32.mrf.mxu1 }
 0x231   : > { %999 = vst [vmem:[%s1695_s17 + $0xf0] sm:$0xff] %v963_v52  ;;  %v1242_v54 = vadd.f32 %v1241_v53, %v1240_v51 }
 0x233   : > { %v966_v55 = vadd.f32 %v1242_v54, %v1692_v17 }
 0x235   : > { %1000 = vst [vmem:[%s1695_s17 + $0xf8] sm:$0xff] %v966_v55 }
 0x236   : > { %1342 = shalt.err (!%p1339_p3)
}
 0x237   : > { %s1343_s12 = scalar_lea.hbm %s1763_s6, 4096  ;;  %s1347_s14 = scalar_lea.hbm %s1816_s5, 8192 }
 0x238   : > { %p1344_p4 = scmp.ne.s32.totalorder %s1763_s6, %s1343_s12  ;;  %p1348_p9 = scmp.lt.s32.totalorder %s1763_s6, %s1816_s5 }
 0x239   : > { %p1349_p10 = scmp.lt.s32.totalorder %s1347_s14, %s1343_s12 }
 0x23a   : > { %p1345_p7 = pnand %p1344_p4, %p1463_p5 }
 0x23b   : > { %p1350_p11 = por %p1349_p10, %p1348_p9 }
 0x23c   : > { %p1346_p8 = pneg %p1345_p7 }
 0x23e   : > { %p1351_p12 = pnand %p1350_p11, %p1346_p8 }
 0x240   : > { %1354 = shalt.err (!%p1351_p12)
}
 0x241   : > { %s1393_s17 = smov 128   ;;  %s1394_s23 = smov 8  }
 0x242   : > { %1259 = dma.vmem_to_hbm [thread:$0]  (%p1463_p5), %s1765_s25, 4096, %s1763_s6, %s1771_s7, %s1393_s17, %s1393_s17, %s1394_s23  }
 0x243 PF: > { %p1265_p13 = scmp.ge.s32.totalorder %s1389_s21, 2  ;;  %s1030_s26 = sand.u32 1, %s1377_s18  }
 0x244   : > { %s1031_s30 = scalar_lea.sflag [#allocation3], %s1030_s26 }
 0x245   : > { %p1262_p0 = pnand %p1265_p13, %p1467_p6 }
 0x247   : > { %p1263_p1 = pneg %p1262_p0 }
 0x249   : > { %1372 = dma.done.wait (%p1263_p1), %s1031_s30, 4096  }
 0x24a   : > { %1374 = vsyncadd (%p1263_p1), %s1031_s30, 4294963200  ;;  %p15_p2 = scmp.ge.s32.totalorder %s1450_s24, 4   ;;  %s1819_s18 = smov %s1381_s19 }
 0x24b   : > { %s1820_s19 = smov %s1385_s20  ;;  %s1821_s20 = smov %s1461_s27 }
 0x24c   : > { %s1822_s21 = smov %s1450_s24  ;;  %17 = sbr.rel (!%p15_p2) target bundleno = 3 (0x3), region = 75 }
 0x251   :  { %1036 = vsyncpa [#allocation3], 1 }
 0x252   :  { %1038 = vsyncpa [#allocation3 + $0x1], 1 }

// kernel: tpu_custom_call.1
= control target key start
LH: loop header
LB: loop body
LE: loop exit
PB: predicated region body
PF: predicated region fallthrough
CT: control target
= control target key end

     0   :  { %10 = vsyncpa [#allocation3], 0  ;;  %s1811_s0 = inlined_call_operand.vmem [shape: f32[512,64], index: 0, kind: input, shape index: {}]   ;;  %s1812_s1 = inlined_call_operand.vmem [shape: bf16[64,256], index: 1, kind: input, shape index: {}]   ;;  %s1813_s2 = inlined_call_operand.vmem [shape: f32[1,256], index: 2, kind: input, shape index: {}]   ;;  %s1814_s3 = inlined_call_operand.vmem [shape: bf16[256,128], index: 3, kind: input, shape index: {}]   ;;  %s1815_s4 = inlined_call_operand.vmem [shape: f32[1,128], index: 4, kind: input, shape index: {}]   ;;  %s1816_s5 = inlined_call_operand.hbm [shape: f32[512,128], index: 5, kind: output, shape index: {}]  }
   0x1   :  { %12 = vsyncpa [#allocation3 + $0x1], 0  ;;  %s1425_s18 = smov 0   ;;  %s1427_s19 = smov 0  }
   0x2   :  { %s1429_s20 = smov 0   ;;  %s1431_s21 = smov 0  }
   0x3 LB: > { %s1446_s22 = sadd.s32 4294967295, %s1389_s21   ;;  %s1077_s23 = sadd.s32 4294967294, %s1389_s21   ;;  %s1389_s21 = sphi %s1431_s21, %s1822_s21   ;;  %s1385_s20 = sphi %s1429_s20, %s1821_s20   ;;  %s1381_s19 = sphi %s1427_s19, %s1820_s19   ;;  %s1377_s18 = sphi %s1425_s18, %s1819_s18  }
   0x4   : > { %s1450_s24 = sadd.s32 1, %s1389_s21   ;;  %s135_s25 = sadd.s32 1, %s1385_s20 }
   0x5   : > { %s132_s26 = ssub.s32 %s1389_s21, %s1450_s24  ;;  %p145_p0 = scmp.ne.s32.totalorder %s1385_s20, %s1381_s19 }
   0x6   : > { %p133_p1 = scmp.eq.s32.totalorder %s132_s26, 0  ;;  %p146_p2 = scmp.eq.s32.totalorder %s1446_s22, 1 }
   0x7   : > { %p151_p3 = scmp.ne.s32.totalorder %s1381_s19, %s1377_s18  ;;  %p152_p4 = scmp.eq.s32.totalorder %s1077_s23, 1 }
   0x8   : > { %s1461_s27 = scalar_select %p133_p1, %s1385_s20, %s135_s25  }
   0x9   : > { %p1463_p5 = por %p146_p2, %p145_p0  ;;  %p1467_p6 = por %p152_p4, %p151_p3 }
   0xa   : > { %p1080_p7 = scmp.ge.s32.totalorder %s1389_s21, 1  ;;  %p191_p8 = scmp.lt.s32.totalorder %s1389_s21, 3 }
   0xc   : > { %p192_p9 = pnand %p1080_p7, %p191_p8 }
   0xd   : > { %s1082_s7 = sshll.u32 (!%p192_p9), %s1446_s22, 5  ;;  %s1130_s23 = sshll.u32 (!%p192_p9), %s1446_s22, 12 }
   0xe   : > { %195 = sbr.rel (%p192_p9) target bundleno = 579 (0x243), region = 40  ;;  %p220_p10 = scmp.lt.s32.totalorder (!%p192_p9), %s1082_s7, 63 }
   0xf   : > { %s1763_s6 = scalar_lea.hbm (!%p192_p9), %s1816_s5, %s1130_s23  ;;  %s1392_s9 = smov (!%p192_p9), [#allocation2]  }
  0x10   : > { %s1333_s10 = sshll.u32 (!%p192_p9), %s1392_s9, 4  ;;  %s1334_s10 = int_to_ptr.vmem [resolvable:$false] %s1333_s10 }
  0x11   : > { %s1335_s11 = scalar_lea.vmem (!%p192_p9), %s1334_s10, 8192 }
  0x13   : > { %v1301_v0 = vld [vmem:[%s1812_s1 + $0x34] ss:$8 sps:$4 sm:$0xff]   ;;  %v1303_v1 = vld [vmem:[%s1812_s1 + $0x30] ss:$8 sps:$4 sm:$0xff]   ;;  %v1391_v2 = vmov 0   ;;  %s1824_s7 = smov (!%p220_p10, %s1082_s7), 63 }
  0x14   : > { %416 = vmatprep.mubr.bf16.mxu0 %v1391_v2  ;;  %392 = vmatprep.subr.bf16.mxu0 %v1301_v0  ;;  %v1304_v3 = vld [vmem:[%s1812_s1 + $0x24] ss:$8 sps:$4 sm:$0xff]   ;;  %v1306_v4 = vld [vmem:[%s1812_s1 + $0x20] ss:$8 sps:$4 sm:$0xff]   ;;  %v1307_v5 = vld [vmem:[%s1812_s1 + $0x14] ss:$8 sps:$4 sm:$0xff]  }
  0x15   : > { %393 = vmatpush1.bf16.msra.mxu0 %v1303_v1  ;;  %s1083_s16 = sshll.u32 %s1824_s7, 3  ;;  %v1309_v6 = vld [vmem:[%s1812_s1 + $0x10] ss:$8 sps:$4 sm:$0xff]   ;;  %v1310_v7 = vld [vmem:[%s1812_s1 + $0x4] ss:$8 sps:$4 sm:$0xff]   ;;  %vm335_vm0 = vcmask 523264  }
  0x16   : > { %394 = vmatprep.subr.bf16.mxu0 %v1304_v3  ;;  %s1499_s8 = scalar_lea.vmem %s1811_s0, %s1083_s16  ;;  %v1312_v8 = vld [vmem:[%s1812_s1] ss:$8 sps:$4 sm:$0xff]   ;;  %v1313_v14 = vld [vmem:[%s1814_s3 + $0x78] sm:$0xff]   ;;  %v1315_v16 = vld [vmem:[%s1814_s3 + $0x70] sm:$0xff]  }
  0x17   : > { %v227_v9 = vld [vmem:[%s1499_s8] sm:$0xff]  ;;  %v228_v10 = vld [vmem:[%s1499_s8 + $0x8] sm:$0xff]  ;;  %v229_v12 = vld [vmem:[%s1499_s8 + $0x10] sm:$0xff]  ;;  %1243 = vmatprep.subr.bf16.mxu1 %v1313_v14 }
  0x18   : > { %v259_v11 = vpack.c.bf16 %v228_v10, %v227_v9  ;;  %v230_v13 = vld [vmem:[%s1499_s8 + $0x18] sm:$0xff]  ;;  %v1316_v17 = vld [vmem:[%s1814_s3 + $0x30] sm:$0xff]   ;;  %v1317_v18 = vld [vmem:[%s1814_s3 + $0x68] sm:$0xff]   ;;  %v285_v10 = vlaneseq }
  0x19   : > { %395 = vmatpush1.bf16.msra.mxu0 %v1306_v4  ;;  %v1314_v15 = vld [vmem:[%s1814_s3 + $0x38] sm:$0xff]   ;;  %v260_v19 = vpack.c.bf16 %v230_v13, %v229_v12  ;;  %v1318_v20 = vld [vmem:[%s1814_s3 + $0x28] sm:$0xff]   ;;  %v231_v21 = vld [vmem:[%s1499_s8 + $0x20] sm:$0xff] }
  0x1a   : > { %396 = vmatprep.subr.bf16.mxu0 %v1307_v5  ;;  %1251 = vmatpush3.bf16.msra.mxu1 %v1314_v15  ;;  %v1319_v22 = vld [vmem:[%s1814_s3 + $0x60] sm:$0xff]   ;;  %v232_v23 = vld [vmem:[%s1499_s8 + $0x28] sm:$0xff]  ;;  %v1321_v25 = vld [vmem:[%s1814_s3 + $0x58] sm:$0xff]  }
  0x1b   : > { %1244 = vmatprep.subr.bf16.mxu1 %v1315_v16  ;;  %v1320_v24 = vld [vmem:[%s1814_s3 + $0x20] sm:$0xff]   ;;  %v261_v26 = vpack.c.bf16 %v232_v23, %v231_v21  ;;  %v1322_v27 = vld [vmem:[%s1814_s3 + $0x18] sm:$0xff]   ;;  %v233_v28 = vld [vmem:[%s1499_s8 + $0x30] sm:$0xff] }
  0x1c   : > { %v234_v29 = vld [vmem:[%s1499_s8 + $0x38] sm:$0xff]  ;;  %v235_v31 = vld [vmem:[%s1499_s8 + $0x40] sm:$0xff]  ;;  %v236_v32 = vld [vmem:[%s1499_s8 + $0x48] sm:$0xff] }
  0x1d   : > { %397 = vmatpush1.bf16.msra.mxu0 %v1309_v6  ;;  %v262_v30 = vpack.c.bf16 %v234_v29, %v233_v28  ;;  %v263_v33 = vpack.c.bf16 %v236_v32, %v235_v31  ;;  %v237_v34 = vld [vmem:[%s1499_s8 + $0x50] sm:$0xff]  ;;  %v238_v35 = vld [vmem:[%s1499_s8 + $0x58] sm:$0xff]  ;;  %v239_v37 = vld [vmem:[%s1499_s8 + $0x60] sm:$0xff] }
  0x1e   : > { %398 = vmatprep.subr.bf16.mxu0 %v1310_v7  ;;  %1252 = vmatpush3.bf16.msra.mxu1 %v1316_v17  ;;  %v264_v36 = vpack.c.bf16 %v238_v35, %v237_v34  ;;  %v240_v38 = vld [vmem:[%s1499_s8 + $0x68] sm:$0xff]  ;;  %v241_v40 = vld [vmem:[%s1499_s8 + $0x70] sm:$0xff]  ;;  %v242_v41 = vld [vmem:[%s1499_s8 + $0x78] sm:$0xff] }
  0x1f   : > { %1245 = vmatprep.subr.bf16.mxu1 %v1317_v18  ;;  %v265_v39 = vpack.c.bf16 %v240_v38, %v239_v37  ;;  %v266_v42 = vpack.c.bf16 %v242_v41, %v241_v40  ;;  %v243_v43 = vld [vmem:[%s1499_s8 + $0x80] sm:$0xff]  ;;  %v244_v44 = vld [vmem:[%s1499_s8 + $0x88] sm:$0xff]  ;;  %v1323_v46 = vld [vmem:[%s1814_s3 + $0x50] sm:$0xff]  }
  0x20   : > { %v267_v45 = vpack.c.bf16 %v244_v44, %v243_v43  ;;  %v245_v47 = vld [vmem:[%s1499_s8 + $0x90] sm:$0xff]  ;;  %v246_v48 = vld [vmem:[%s1499_s8 + $0x98] sm:$0xff]  ;;  %v1325_v51 = vld [vmem:[%s1814_s3 + $0x48] sm:$0xff]  }
  0x21   : > { %399 = vmatpush1.bf16.msra.mxu0 %v1312_v8  ;;  %v1324_v49 = vld [vmem:[%s1814_s3 + $0x10] sm:$0xff]   ;;  %v268_v50 = vpack.c.bf16 %v246_v48, %v245_v47  ;;  %v1326_v52 = vld [vmem:[%s1814_s3 + $0x8] sm:$0xff]   ;;  %v1327_v53 = vld [vmem:[%s1814_s3 + $0x40] sm:$0xff]  }
  0x22   : > { %1131 = vmatprep.subr.bf16.mxu0 %v1313_v14  ;;  %1253 = vmatpush3.bf16.msra.mxu1 %v1318_v20  ;;  %v247_v54 = vld [vmem:[%s1499_s8 + $0xa0] sm:$0xff]  ;;  %v248_v55 = vld [vmem:[%s1499_s8 + $0xa8] sm:$0xff]  ;;  %v249_v58 = vld [vmem:[%s1499_s8 + $0xb0] sm:$0xff] }
  0x23   : > { %1246 = vmatprep.subr.bf16.mxu1 %v1319_v22  ;;  %v1328_v56 = vld [vmem:[%s1814_s3] sm:$0xff]   ;;  %v269_v57 = vpack.c.bf16 %v248_v55, %v247_v54  ;;  %v250_v59 = vld [vmem:[%s1499_s8 + $0xb8] sm:$0xff]  ;;  %v252_v62 = vld [vmem:[%s1499_s8 + $0xc8] sm:$0xff] }
  0x24   : > { %1092 = vmatmul.mubr.msk.bf16.vlgmr.msra.gmra.mxu0 %vm335_vm0, %v259_v11  ;;  %v270_v60 = vpack.c.bf16 %v250_v59, %v249_v58  ;;  %v251_v61 = vld [vmem:[%s1499_s8 + $0xc0] sm:$0xff]  ;;  %v253_v0 = vld [vmem:[%s1499_s8 + $0xd0] sm:$0xff]  ;;  %v254_v1 = vld [vmem:[%s1499_s8 + $0xd8] sm:$0xff]  ;;  %v286_v11 = vshrl.u32 %v285_v10, 7 }
  0x25   : > { %426 = vmatprep.mubr.bf16.mxu0 %v1391_v2  ;;  %1132 = vmatpush3.bf16.msra.mxu0 %v1314_v15  ;;  %v271_v63 = vpack.c.bf16 %v252_v62, %v251_v61  ;;  %v272_v3 = vpack.c.bf16 %v254_v1, %v253_v0  ;;  %v255_v4 = vld [vmem:[%s1499_s8 + $0xe0] sm:$0xff]  ;;  %v256_v5 = vld [vmem:[%s1499_s8 + $0xe8] sm:$0xff]  ;;  %v257_v7 = vld [vmem:[%s1499_s8 + $0xf0] sm:$0xff] }
  0x26   : > { %1133 = vmatprep.subr.bf16.mxu0 %v1315_v16  ;;  %1254 = vmatpush3.bf16.msra.mxu1 %v1320_v24  ;;  %v273_v6 = vpack.c.bf16 %v256_v5, %v255_v4  ;;  %v258_v8 = vld [vmem:[%s1499_s8 + $0xf8] sm:$0xff]  ;;  %v291_v12 = vsub.s32 1, %v286_v11  ;;  %v287_v13 = vsub.s32 0, %v286_v11  ;;  %v283_v14 = vld [vmem:[%s1813_s2] sm:$0x3]  ;;  %s216_s8 = sand.u32 1, %s1381_s19  }
  0x27   : > { %1247 = vmatprep.subr.bf16.mxu1 %v1321_v25  ;;  %v274_v9 = vpack.c.bf16 %v258_v8, %v257_v7  ;;  %s1081_s14 = sshll.u32 %s216_s8, 8  ;;  %s1771_s7 = scalar_lea.sflag [#allocation3], %s216_s8 }
  0x28   : > { %v1618_v16 = vrot.slane %v283_v14, %v291_v12  ;;  %s1695_s17 = scalar_lea.vmem [#allocation2], %s1081_s14 }
  0x29   : > { %1134 = vmatpush3.bf16.msra.mxu0 %v1316_v17  ;;  %v1620_v17 = vrot.slane %v283_v14, %v287_v13  ;;  %s1015_s25 = sshll.u32 %s1695_s17, 4  ;;  %s1765_s25 = int_to_ptr.vmem [resolvable:$true] %s1015_s25 }
  0x2a   : > { %1135 = vmatprep.subr.bf16.mxu0 %v1317_v18  ;;  %1255 = vmatpush3.bf16.msra.mxu1 %v1322_v27  ;;  %s1329_s22 = scalar_lea.vmem %s1765_s25, 4096  ;;  %p1336_p0 = scmp.lt.s32.totalorder %s1765_s25, %s1334_s10 }
  0x2b   : > { %1248 = vmatprep.subr.bf16.mxu1 %v1323_v46  ;;  %p1330_p11 = scmp.ne.s32.totalorder %s1765_s25, %s1329_s22  ;;  %p1337_p1 = scmp.lt.s32.totalorder %s1335_s11, %s1329_s22 }
  0x2c   : > { %1093 = vmatmul.mubr.msk.bf16.gmra.mxu0 %vm335_vm0, %v260_v19 }
  0x2d   : > { %436 = vmatprep.mubr.bf16.mxu0 %v1391_v2  ;;  %1136 = vmatpush3.bf16.msra.mxu0 %v1318_v20  ;;  %p1331_p12 = pnand %p1330_p11, %p1463_p5  ;;  %p1338_p2 = por %p1337_p1, %p1336_p0 }
  0x2e   : > { %1137 = vmatprep.subr.bf16.mxu0 %v1319_v22  ;;  %1256 = vmatpush3.bf16.msra.mxu1 %v1324_v49 }
  0x2f   : > { %1249 = vmatprep.subr.bf16.mxu1 %v1325_v51  ;;  %p1332_p13 = pneg %p1331_p12 }
  0x31   : > { %1138 = vmatpush3.bf16.msra.mxu0 %v1320_v24  ;;  %p1339_p3 = pnand %p1338_p2, %p1332_p13 }
  0x32   : > { %1139 = vmatprep.subr.bf16.mxu0 %v1321_v25  ;;  %1257 = vmatpush3.bf16.msra.mxu1 %v1326_v52 }
  0x33   : > { %1250 = vmatprep.subr.bf16.mxu1 %v1327_v53 }
  0x34   : > { %1094 = vmatmul.mubr.msk.bf16.gmra.mxu0 %vm335_vm0, %v261_v26 }
  0x35   : > { %446 = vmatprep.mubr.bf16.mxu0 %v1391_v2  ;;  %1140 = vmatpush3.bf16.msra.mxu0 %v1322_v27 }
  0x36   : > { %1141 = vmatprep.subr.bf16.mxu0 %v1323_v46  ;;  %1258 = vmatpush3.bf16.msra.mxu1 %v1328_v56 }
  0x39   : > { %1142 = vmatpush3.bf16.msra.mxu0 %v1324_v49 }
  0x3a   : > { %1143 = vmatprep.subr.bf16.mxu0 %v1325_v51 }
  0x3c   : > { %1095 = vmatmul.mubr.msk.bf16.gmra.mxu0 %vm335_vm0, %v262_v30 }
  0x3d   : > { %456 = vmatprep.mubr.bf16.mxu0 %v1391_v2  ;;  %1144 = vmatpush3.bf16.msra.mxu0 %v1326_v52 }
  0x3e   : > { %1145 = vmatprep.subr.bf16.mxu0 %v1327_v53 }
  0x41   : > { %1146 = vmatpush3.bf16.msra.mxu0 %v1328_v56 }
  0x44   : > { %1096 = vmatmul.mubr.msk.bf16.gmra.mxu0 %vm335_vm0, %v263_v33 }
  0x45   : > { %466 = vmatprep.mubr.bf16.mxu0 %v1391_v2 }
  0x4c   : > { %1097 = vmatmul.mubr.msk.bf16.gmra.mxu0 %vm335_vm0, %v264_v36 }
  0x4d   : > { %476 = vmatprep.mubr.bf16.mxu0 %v1391_v2 }
  0x54   : > { %1098 = vmatmul.mubr.msk.bf16.gmra.mxu0 %vm335_vm0, %v265_v39 }
  0x55   : > { %486 = vmatprep.mubr.bf16.mxu0 %v1391_v2 }
  0x5c   : > { %1099 = vmatmul.mubr.msk.bf16.gmra.mxu0 %vm335_vm0, %v266_v42 }
  0x5d   : > { %496 = vmatprep.mubr.bf16.mxu0 %v1391_v2 }
  0x64   : > { %1100 = vmatmul.mubr.msk.bf16.gmra.mxu0 %vm335_vm0, %v267_v45 }
  0x65   : > { %506 = vmatprep.mubr.bf16.mxu0 %v1391_v2 }
  0x6c   : > { %1101 = vmatmul.mubr.msk.bf16.gmra.mxu0 %vm335_vm0, %v268_v50 }
  0x6d   : > { %516 = vmatprep.mubr.bf16.mxu0 %v1391_v2 }
  0x74   : > { %1102 = vmatmul.mubr.msk.bf16.gmra.mxu0 %vm335_vm0, %v269_v57 }
  0x75   : > { %526 = vmatprep.mubr.bf16.mxu0 %v1391_v2 }
  0x7c   : > { %1103 = vmatmul.mubr.msk.bf16.gmra.mxu0 %vm335_vm0, %v270_v60 }
  0x7d   : > { %536 = vmatprep.mubr.bf16.mxu0 %v1391_v2 }
  0x84   : > { %1104 = vmatmul.mubr.msk.bf16.gmra.mxu0 %vm335_vm0, %v271_v63 }
  0x85   : > { %546 = vmatprep.mubr.bf16.mxu0 %v1391_v2 }
  0x8c   : > { %1105 = vmatmul.mubr.msk.bf16.gmra.mxu0 %vm335_vm0, %v272_v3 }
  0x8d   : > { %556 = vmatprep.mubr.bf16.mxu0 %v1391_v2 }
  0x94   : > { %1106 = vmatmul.mubr.msk.bf16.gmra.mxu0 %vm335_vm0, %v273_v6 }
  0x95   : > { %566 = vmatprep.mubr.bf16.mxu0 %v1391_v2 }
  0x9c   : > { %1107 = vmatmul.mubr.msk.bf16.gmra.mxu0 %vm335_vm0, %v274_v9 }
  0xe4   : > { %v418_v15 = vpop.f32.mrf.mxu0 }
  0xe5   : > { %v419_v21 = vadd.f32 %v418_v15, %v1620_v17 }
  0xe6   : > { %v420_v18 = vpop.f32.mrf.mxu0 }
  0xe7   : > { %v421_v19 = vadd.f32 %v420_v18, %v1618_v16  ;;  %v577_v28 = vmax.f32 %v419_v21, 0.0 }
  0xe8   : > { %v422_v2 = vpop.f32.mrf.mxu0 }
  0xe9   : > { %v423_v20 = vadd.f32 %v422_v2, %v1620_v17  ;;  %v578_v26 = vmax.f32 %v421_v19, 0.0 }
  0xea   : > { %v424_v22 = vpop.f32.mrf.mxu0 }
  0xeb   : > { %v425_v23 = vadd.f32 %v424_v22, %v1618_v16  ;;  %v579_v24 = vmax.f32 %v423_v20, 0.0 }
  0xec   : > { %v428_v25 = vpop.f32.mrf.mxu0 }
  0xed   : > { %v580_v27 = vmax.f32 %v425_v23, 0.0  ;;  %v641_v31 = vpack.c.bf16 %v579_v24, %v577_v28  ;;  %v429_v35 = vadd.f32 %v428_v25, %v1620_v17 }
  0xee   : > { %v430_v29 = vpop.f32.mrf.mxu0 }
  0xef   : > { %v642_v30 = vpack.c.bf16 %v580_v27, %v578_v26  ;;  %v431_v33 = vadd.f32 %v430_v29, %v1618_v16  ;;  %v581_v42 = vmax.f32 %v429_v35, 0.0 }
  0xf0   : > { %v432_v32 = vpop.f32.mrf.mxu0 }
  0xf1   : > { %v433_v34 = vadd.f32 %v432_v32, %v1620_v17  ;;  %840 = vmatprep.mubr.bf16.mxu0 %v642_v30  ;;  %v582_v40 = vmax.f32 %v431_v33, 0.0 }
  0xf2   : > { %v434_v36 = vpop.f32.mrf.mxu0  ;;  %841 = vmatmul.mubr.bf16.vlgmr.msra.gmra.mxu0 %v641_v31 }
  0xf3   : > { %v435_v37 = vadd.f32 %v434_v36, %v1618_v16  ;;  %v583_v38 = vmax.f32 %v433_v34, 0.0 }
  0xf4   : > { %v438_v39 = vpop.f32.mrf.mxu0 }
  0xf5   : > { %v584_v41 = vmax.f32 %v435_v37, 0.0  ;;  %v643_v45 = vpack.c.bf16 %v583_v38, %v581_v42  ;;  %v439_v49 = vadd.f32 %v438_v39, %v1620_v17 }
  0xf6   : > { %v440_v43 = vpop.f32.mrf.mxu0 }
  0xf7   : > { %v644_v44 = vpack.c.bf16 %v584_v41, %v582_v40  ;;  %v441_v47 = vadd.f32 %v440_v43, %v1618_v16  ;;  %v585_v56 = vmax.f32 %v439_v49, 0.0 }
  0xf8   : > { %v442_v46 = vpop.f32.mrf.mxu0 }
  0xf9   : > { %v443_v48 = vadd.f32 %v442_v46, %v1620_v17  ;;  %848 = vmatprep.mubr.bf16.mxu1 %v644_v44  ;;  %v586_v54 = vmax.f32 %v441_v47, 0.0 }
  0xfa   : > { %v444_v50 = vpop.f32.mrf.mxu0  ;;  %849 = vmatmul.mubr.bf16.vlgmr.msra.gmra.mxu1 %v643_v45 }
  0xfb   : > { %v445_v51 = vadd.f32 %v444_v50, %v1618_v16  ;;  %v587_v52 = vmax.f32 %v443_v48, 0.0 }
  0xfc   : > { %v448_v53 = vpop.f32.mrf.mxu0 }
  0xfd   : > { %v588_v55 = vmax.f32 %v445_v51, 0.0  ;;  %v645_v59 = vpack.c.bf16 %v587_v52, %v585_v56  ;;  %v449_v63 = vadd.f32 %v448_v53, %v1620_v17 }
  0xfe   : > { %v450_v57 = vpop.f32.mrf.mxu0 }
  0xff   : > { %v646_v58 = vpack.c.bf16 %v588_v55, %v586_v54  ;;  %v451_v61 = vadd.f32 %v450_v57, %v1618_v16  ;;  %v589_v7 = vmax.f32 %v449_v63, 0.0 }
 0x100   : > { %v452_v60 = vpop.f32.mrf.mxu0 }
 0x101   : > { %v453_v62 = vadd.f32 %v452_v60, %v1620_v17  ;;  %856 = vmatprep.mubr.bf16.mxu1 %v646_v58  ;;  %v590_v5 = vmax.f32 %v451_v61, 0.0 }
 0x102   : > { %v454_v0 = vpop.f32.mrf.mxu0  ;;  %857 = vmatmul.mubr.bf16.gmra.mxu1 %v645_v59 }
 0x103   : > { %v455_v1 = vadd.f32 %v454_v0, %v1618_v16  ;;  %v591_v3 = vmax.f32 %v453_v62, 0.0 }
 0x104   : > { %v458_v4 = vpop.f32.mrf.mxu0 }
 0x105   : > { %v592_v6 = vmax.f32 %v455_v1, 0.0  ;;  %v647_v10 = vpack.c.bf16 %v591_v3, %v589_v7  ;;  %v459_v14 = vadd.f32 %v458_v4, %v1620_v17 }
 0x106   : > { %v460_v8 = vpop.f32.mrf.mxu0 }
 0x107   : > { %v648_v9 = vpack.c.bf16 %v592_v6, %v590_v5  ;;  %v461_v12 = vadd.f32 %v460_v8, %v1618_v16  ;;  %v593_v22 = vmax.f32 %v459_v14, 0.0 }
 0x108   : > { %v462_v11 = vpop.f32.mrf.mxu0 }
 0x109   : > { %v463_v13 = vadd.f32 %v462_v11, %v1620_v17  ;;  %864 = vmatprep.mubr.bf16.mxu1 %v648_v9  ;;  %v594_v20 = vmax.f32 %v461_v12, 0.0 }
 0x10a   : > { %v464_v15 = vpop.f32.mrf.mxu0  ;;  %865 = vmatmul.mubr.bf16.gmra.mxu1 %v647_v10 }
 0x10b   : > { %v465_v18 = vadd.f32 %v464_v15, %v1618_v16  ;;  %v595_v2 = vmax.f32 %v463_v13, 0.0 }
 0x10c   : > { %v468_v19 = vpop.f32.mrf.mxu0 }
 0x10d   : > { %v596_v21 = vmax.f32 %v465_v18, 0.0  ;;  %v649_v25 = vpack.c.bf16 %v595_v2, %v593_v22  ;;  %v469_v29 = vadd.f32 %v468_v19, %v1620_v17 }
 0x10e   : > { %v470_v23 = vpop.f32.mrf.mxu0 }
 0x10f   : > { %v650_v24 = vpack.c.bf16 %v596_v21, %v594_v20  ;;  %v471_v27 = vadd.f32 %v470_v23, %v1618_v16  ;;  %v597_v36 = vmax.f32 %v469_v29, 0.0 }
 0x110   : > { %v472_v26 = vpop.f32.mrf.mxu0 }
 0x111   : > { %v473_v28 = vadd.f32 %v472_v26, %v1620_v17  ;;  %872 = vmatprep.mubr.bf16.mxu1 %v650_v24  ;;  %v598_v34 = vmax.f32 %v471_v27, 0.0 }
 0x112   : > { %v474_v30 = vpop.f32.mrf.mxu0  ;;  %873 = vmatmul.mubr.bf16.gmra.mxu1 %v649_v25 }
 0x113   : > { %v475_v31 = vadd.f32 %v474_v30, %v1618_v16  ;;  %v599_v32 = vmax.f32 %v473_v28, 0.0 }
 0x114   : > { %v478_v33 = vpop.f32.mrf.mxu0 }
 0x115   : > { %v600_v35 = vmax.f32 %v475_v31, 0.0  ;;  %v651_v39 = vpack.c.bf16 %v599_v32, %v597_v36  ;;  %v479_v43 = vadd.f32 %v478_v33, %v1620_v17 }
 0x116   : > { %v480_v37 = vpop.f32.mrf.mxu0 }
 0x117   : > { %v652_v38 = vpack.c.bf16 %v600_v35, %v598_v34  ;;  %v481_v41 = vadd.f32 %v480_v37, %v1618_v16  ;;  %v601_v50 = vmax.f32 %v479_v43, 0.0 }
 0x118   : > { %v482_v40 = vpop.f32.mrf.mxu0 }
 0x119   : > { %v483_v42 = vadd.f32 %v482_v40, %v1620_v17  ;;  %880 = vmatprep.mubr.bf16.mxu1 %v652_v38  ;;  %v602_v48 = vmax.f32 %v481_v41, 0.0 }
 0x11a   : > { %v484_v44 = vpop.f32.mrf.mxu0  ;;  %881 = vmatmul.mubr.bf16.gmra.mxu1 %v651_v39 }
 0x11b   : > { %v485_v45 = vadd.f32 %v484_v44, %v1618_v16  ;;  %v603_v46 = vmax.f32 %v483_v42, 0.0 }
 0x11c   : > { %v488_v47 = vpop.f32.mrf.mxu0 }
 0x11d   : > { %v604_v49 = vmax.f32 %v485_v45, 0.0  ;;  %v653_v53 = vpack.c.bf16 %v603_v46, %v601_v50  ;;  %v489_v57 = vadd.f32 %v488_v47, %v1620_v17 }
 0x11e   : > { %v490_v51 = vpop.f32.mrf.mxu0 }
 0x11f   : > { %v654_v52 = vpack.c.bf16 %v604_v49, %v602_v48  ;;  %v491_v55 = vadd.f32 %v490_v51, %v1618_v16  ;;  %v605_v0 = vmax.f32 %v489_v57, 0.0 }
 0x120   : > { %v492_v54 = vpop.f32.mrf.mxu0 }
 0x121   : > { %v493_v56 = vadd.f32 %v492_v54, %v1620_v17  ;;  %888 = vmatprep.mubr.bf16.mxu1 %v654_v52  ;;  %v606_v62 = vmax.f32 %v491_v55, 0.0 }
 0x122   : > { %v494_v58 = vpop.f32.mrf.mxu0  ;;  %889 = vmatmul.mubr.bf16.gmra.mxu1 %v653_v53 }
 0x123   : > { %v495_v59 = vadd.f32 %v494_v58, %v1618_v16  ;;  %v607_v60 = vmax.f32 %v493_v56, 0.0 }
 0x124   : > { %v498_v61 = vpop.f32.mrf.mxu0 }
 0x125   : > { %v608_v63 = vmax.f32 %v495_v59, 0.0  ;;  %v655_v4 = vpack.c.bf16 %v607_v60, %v605_v0  ;;  %v499_v8 = vadd.f32 %v498_v61, %v1620_v17 }
 0x126   : > { %v500_v1 = vpop.f32.mrf.mxu0 }
 0x127   : > { %v656_v3 = vpack.c.bf16 %v608_v63, %v606_v62  ;;  %v501_v6 = vadd.f32 %v500_v1, %v1618_v16  ;;  %v609_v15 = vmax.f32 %v499_v8, 0.0 }
 0x128   : > { %v502_v5 = vpop.f32.mrf.mxu0 }
 0x129   : > { %v503_v7 = vadd.f32 %v502_v5, %v1620_v17  ;;  %896 = vmatprep.mubr.bf16.mxu1 %v656_v3  ;;  %v610_v13 = vmax.f32 %v501_v6, 0.0 }
 0x12a   : > { %v504_v9 = vpop.f32.mrf.mxu0  ;;  %897 = vmatmul.mubr.bf16.gmra.mxu1 %v655_v4 }
 0x12b   : > { %v505_v10 = vadd.f32 %v504_v9, %v1618_v16  ;;  %v611_v11 = vmax.f32 %v503_v7, 0.0 }
 0x12c   : > { %v508_v12 = vpop.f32.mrf.mxu0 }
 0x12d   : > { %v612_v14 = vmax.f32 %v505_v10, 0.0  ;;  %v657_v19 = vpack.c.bf16 %v611_v11, %v609_v15  ;;  %v509_v23 = vadd.f32 %v508_v12, %v1620_v17 }
 0x12e   : > { %v510_v18 = vpop.f32.mrf.mxu0 }
 0x12f   : > { %v658_v2 = vpack.c.bf16 %v612_v14, %v610_v13  ;;  %v511_v21 = vadd.f32 %v510_v18, %v1618_v16  ;;  %v613_v30 = vmax.f32 %v509_v23, 0.0 }
 0x130   : > { %v512_v20 = vpop.f32.mrf.mxu0 }
 0x131   : > { %v513_v22 = vadd.f32 %v512_v20, %v1620_v17  ;;  %904 = vmatprep.mubr.bf16.mxu1 %v658_v2  ;;  %v614_v28 = vmax.f32 %v511_v21, 0.0 }
 0x132   : > { %v514_v24 = vpop.f32.mrf.mxu0  ;;  %905 = vmatmul.mubr.bf16.gmra.mxu1 %v657_v19 }
 0x133   : > { %v515_v25 = vadd.f32 %v514_v24, %v1618_v16  ;;  %v615_v26 = vmax.f32 %v513_v22, 0.0 }
 0x134   : > { %v518_v27 = vpop.f32.mrf.mxu0 }
 0x135   : > { %v616_v29 = vmax.f32 %v515_v25, 0.0  ;;  %v659_v33 = vpack.c.bf16 %v615_v26, %v613_v30  ;;  %v519_v37 = vadd.f32 %v518_v27, %v1620_v17 }
 0x136   : > { %v520_v31 = vpop.f32.mrf.mxu0 }
 0x137   : > { %v660_v32 = vpack.c.bf16 %v616_v29, %v614_v28  ;;  %v521_v35 = vadd.f32 %v520_v31, %v1618_v16  ;;  %v617_v44 = vmax.f32 %v519_v37, 0.0 }
 0x138   : > { %v522_v34 = vpop.f32.mrf.mxu0 }
 0x139   : > { %v523_v36 = vadd.f32 %v522_v34, %v1620_v17  ;;  %912 = vmatprep.mubr.bf16.mxu1 %v660_v32  ;;  %v618_v42 = vmax.f32 %v521_v35, 0.0 }
 0x13a   : > { %v524_v38 = vpop.f32.mrf.mxu0  ;;  %913 = vmatmul.mubr.bf16.gmra.mxu1 %v659_v33 }
 0x13b   : > { %v525_v39 = vadd.f32 %v524_v38, %v1618_v16  ;;  %v619_v40 = vmax.f32 %v523_v36, 0.0 }
 0x13c   : > { %v528_v41 = vpop.f32.mrf.mxu0 }
 0x13d   : > { %v620_v43 = vmax.f32 %v525_v39, 0.0  ;;  %v661_v47 = vpack.c.bf16 %v619_v40, %v617_v44  ;;  %v529_v51 = vadd.f32 %v528_v41, %v1620_v17 }
 0x13e   : > { %v530_v45 = vpop.f32.mrf.mxu0 }
 0x13f   : > { %v662_v46 = vpack.c.bf16 %v620_v43, %v618_v42  ;;  %v531_v49 = vadd.f32 %v530_v45, %v1618_v16  ;;  %v621_v58 = vmax.f32 %v529_v51, 0.0 }
 0x140   : > { %v532_v48 = vpop.f32.mrf.mxu0 }
 0x141   : > { %v533_v50 = vadd.f32 %v532_v48, %v1620_v17  ;;  %920 = vmatprep.mubr.bf16.mxu1 %v662_v46  ;;  %v622_v56 = vmax.f32 %v531_v49, 0.0 }
 0x142   : > { %v534_v52 = vpop.f32.mrf.mxu0  ;;  %921 = vmatmul.mubr.bf16.gmra.mxu1 %v661_v47 }
 0x143   : > { %v535_v53 = vadd.f32 %v534_v52, %v1618_v16  ;;  %v623_v54 = vmax.f32 %v533_v50, 0.0 }
 0x144   : > { %v538_v55 = vpop.f32.mrf.mxu0 }
 0x145   : > { %v624_v57 = vmax.f32 %v535_v53, 0.0  ;;  %v663_v61 = vpack.c.bf16 %v623_v54, %v621_v58  ;;  %v539_v1 = vadd.f32 %v538_v55, %v1620_v17 }
 0x146   : > { %v540_v59 = vpop.f32.mrf.mxu0 }
 0x147   : > { %v664_v60 = vpack.c.bf16 %v624_v57, %v622_v56  ;;  %v541_v63 = vadd.f32 %v540_v59, %v1618_v16  ;;  %v625_v9 = vmax.f32 %v539_v1, 0.0 }
 0x148   : > { %v542_v62 = vpop.f32.mrf.mxu0 }
 0x149   : > { %v543_v0 = vadd.f32 %v542_v62, %v1620_v17  ;;  %928 = vmatprep.mubr.bf16.mxu1 %v664_v60  ;;  %v626_v7 = vmax.f32 %v541_v63, 0.0 }
 0x14a   : > { %v544_v3 = vpop.f32.mrf.mxu0  ;;  %929 = vmatmul.mubr.bf16.gmra.mxu1 %v663_v61 }
 0x14b   : > { %v545_v4 = vadd.f32 %v544_v3, %v1618_v16  ;;  %v627_v5 = vmax.f32 %v543_v0, 0.0 }
 0x14c   : > { %v548_v6 = vpop.f32.mrf.mxu0 }
 0x14d   : > { %v628_v8 = vmax.f32 %v545_v4, 0.0  ;;  %v665_v12 = vpack.c.bf16 %v627_v5, %v625_v9  ;;  %v549_v18 = vadd.f32 %v548_v6, %v1620_v17 }
 0x14e   : > { %v550_v10 = vpop.f32.mrf.mxu0 }
 0x14f   : > { %v666_v11 = vpack.c.bf16 %v628_v8, %v626_v7  ;;  %v551_v14 = vadd.f32 %v550_v10, %v1618_v16  ;;  %v629_v24 = vmax.f32 %v549_v18, 0.0 }
 0x150   : > { %v552_v13 = vpop.f32.mrf.mxu0 }
 0x151   : > { %v553_v15 = vadd.f32 %v552_v13, %v1620_v17  ;;  %936 = vmatprep.mubr.bf16.mxu1 %v666_v11  ;;  %v630_v22 = vmax.f32 %v551_v14, 0.0 }
 0x152   : > { %v554_v2 = vpop.f32.mrf.mxu0  ;;  %937 = vmatmul.mubr.bf16.gmra.mxu1 %v665_v12 }
 0x153   : > { %v555_v19 = vadd.f32 %v554_v2, %v1618_v16  ;;  %v631_v20 = vmax.f32 %v553_v15, 0.0 }
 0x154   : > { %v558_v21 = vpop.f32.mrf.mxu0 }
 0x155   : > { %v632_v23 = vmax.f32 %v555_v19, 0.0  ;;  %v667_v27 = vpack.c.bf16 %v631_v20, %v629_v24  ;;  %v559_v31 = vadd.f32 %v558_v21, %v1620_v17 }
 0x156   : > { %v560_v25 = vpop.f32.mrf.mxu0 }
 0x157   : > { %v668_v26 = vpack.c.bf16 %v632_v23, %v630_v22  ;;  %v561_v29 = vadd.f32 %v560_v25, %v1618_v16  ;;  %v633_v38 = vmax.f32 %v559_v31, 0.0 }
 0x158   : > { %v562_v28 = vpop.f32.mrf.mxu0 }
 0x159   : > { %v563_v30 = vadd.f32 %v562_v28, %v1620_v17  ;;  %944 = vmatprep.mubr.bf16.mxu1 %v668_v26  ;;  %v634_v36 = vmax.f32 %v561_v29, 0.0 }
 0x15a   : > { %v564_v32 = vpop.f32.mrf.mxu0  ;;  %945 = vmatmul.mubr.bf16.gmra.mxu1 %v667_v27 }
 0x15b   : > { %v565_v33 = vadd.f32 %v564_v32, %v1618_v16  ;;  %v635_v34 = vmax.f32 %v563_v30, 0.0 }
 0x15c   : > { %v568_v35 = vpop.f32.mrf.mxu0 }
 0x15d   : > { %v636_v37 = vmax.f32 %v565_v33, 0.0  ;;  %v669_v41 = vpack.c.bf16 %v635_v34, %v633_v38  ;;  %v569_v45 = vadd.f32 %v568_v35, %v1620_v17 }
 0x15e   : > { %v570_v39 = vpop.f32.mrf.mxu0 }
 0x15f   : > { %v670_v40 = vpack.c.bf16 %v636_v37, %v634_v36  ;;  %v571_v43 = vadd.f32 %v570_v39, %v1618_v16  ;;  %v637_v51 = vmax.f32 %v569_v45, 0.0 }
 0x160   : > { %v572_v42 = vpop.f32.mrf.mxu0 }
 0x161   : > { %v573_v44 = vadd.f32 %v572_v42, %v1620_v17  ;;  %952 = vmatprep.mubr.bf16.mxu1 %v670_v40  ;;  %v638_v49 = vmax.f32 %v571_v43, 0.0  ;;  %v1692_v17 = vld [vmem:[%s1815_s4] ss:$0 sm:$0xff] }
 0x162   : > { %v574_v46 = vpop.f32.mrf.mxu0  ;;  %953 = vmatmul.mubr.bf16.gmra.mxu1 %v669_v41 }
 0x163   : > { %v575_v47 = vadd.f32 %v574_v46, %v1618_v16  ;;  %v639_v48 = vmax.f32 %v573_v44, 0.0 }
 0x165   : > { %v640_v50 = vmax.f32 %v575_v47, 0.0  ;;  %v671_v53 = vpack.c.bf16 %v639_v48, %v637_v51 }
 0x167   : > { %v672_v52 = vpack.c.bf16 %v640_v50, %v638_v49 }
 0x169   : > { %960 = vmatprep.mubr.bf16.mxu1 %v672_v52 }
 0x16a   : > { %961 = vmatmul.mubr.bf16.gmra.mxu1 %v671_v53 }
 0x1b2   : > { %v1147_v54 = vpop.f32.mrf.mxu0 }
 0x1b4   : > { %v1148_v55 = vpop.f32.mrf.mxu0 }
 0x1b5   : > { %v1149_v56 = vadd.f32 %v1148_v55, %v1147_v54 }
 0x1b6   : > { %v1150_v16 = vpop.f32.mrf.mxu0 }
 0x1b7   : > { %v843_v57 = vadd.f32 %v1149_v56, %v1692_v17 }
 0x1b8   : > { %v1151_v58 = vpop.f32.mrf.mxu0 }
 0x1b9   : > { %969 = vst [vmem:[%s1695_s17] sm:$0xff] %v843_v57  ;;  %v1152_v59 = vadd.f32 %v1151_v58, %v1150_v16 }
 0x1ba   : > { %v1153_v60 = vpop.f32.mrf.mxu1 }
 0x1bb   : > { %v846_v61 = vadd.f32 %v1152_v59, %v1692_v17 }
 0x1bc   : > { %v1154_v62 = vpop.f32.mrf.mxu1 }
 0x1bd   : > { %970 = vst [vmem:[%s1695_s17 + $0x8] sm:$0xff] %v846_v61  ;;  %v1155_v63 = vadd.f32 %v1154_v62, %v1153_v60 }
 0x1be   : > { %v1156_v0 = vpop.f32.mrf.mxu1 }
 0x1bf   : > { %v851_v1 = vadd.f32 %v1155_v63, %v1692_v17 }
 0x1c0   : > { %v1157_v3 = vpop.f32.mrf.mxu1 }
 0x1c1   : > { %971 = vst [vmem:[%s1695_s17 + $0x10] sm:$0xff] %v851_v1  ;;  %v1158_v4 = vadd.f32 %v1157_v3, %v1156_v0 }
 0x1c2   : > { %v1159_v5 = vpop.f32.mrf.mxu1 }
 0x1c3   : > { %v854_v6 = vadd.f32 %v1158_v4, %v1692_v17 }
 0x1c4   : > { %v1160_v7 = vpop.f32.mrf.mxu1 }
 0x1c5   : > { %972 = vst [vmem:[%s1695_s17 + $0x18] sm:$0xff] %v854_v6  ;;  %v1161_v8 = vadd.f32 %v1160_v7, %v1159_v5 }
 0x1c6   : > { %v1162_v9 = vpop.f32.mrf.mxu1 }
 0x1c7   : > { %v859_v10 = vadd.f32 %v1161_v8, %v1692_v17 }
 0x1c8   : > { %v1163_v11 = vpop.f32.mrf.mxu1 }
 0x1c9   : > { %973 = vst [vmem:[%s1695_s17 + $0x20] sm:$0xff] %v859_v10  ;;  %v1164_v12 = vadd.f32 %v1163_v11, %v1162_v9 }
 0x1ca   : > { %v1165_v13 = vpop.f32.mrf.mxu1 }
 0x1cb   : > { %v862_v14 = vadd.f32 %v1164_v12, %v1692_v17 }
 0x1cc   : > { %v1166_v15 = vpop.f32.mrf.mxu1 }
 0x1cd   : > { %974 = vst [vmem:[%s1695_s17 + $0x28] sm:$0xff] %v862_v14  ;;  %v1167_v18 = vadd.f32 %v1166_v15, %v1165_v13 }
 0x1ce   : > { %v1168_v2 = vpop.f32.mrf.mxu1 }
 0x1cf   : > { %v867_v19 = vadd.f32 %v1167_v18, %v1692_v17 }
 0x1d0   : > { %v1169_v20 = vpop.f32.mrf.mxu1 }
 0x1d1   : > { %975 = vst [vmem:[%s1695_s17 + $0x30] sm:$0xff] %v867_v19  ;;  %v1170_v21 = vadd.f32 %v1169_v20, %v1168_v2 }
 0x1d2   : > { %v1171_v22 = vpop.f32.mrf.mxu1 }
 0x1d3   : > { %v870_v23 = vadd.f32 %v1170_v21, %v1692_v17 }
 0x1d4   : > { %v1172_v24 = vpop.f32.mrf.mxu1 }
 0x1d5   : > { %976 = vst [vmem:[%s1695_s17 + $0x38] sm:$0xff] %v870_v23  ;;  %v1173_v25 = vadd.f32 %v1172_v24, %v1171_v22 }
 0x1d6   : > { %v1174_v26 = vpop.f32.mrf.mxu1 }
 0x1d7   : > { %v875_v27 = vadd.f32 %v1173_v25, %v1692_v17 }
 0x1d8   : > { %v1175_v28 = vpop.f32.mrf.mxu1 }
 0x1d9   : > { %977 = vst [vmem:[%s1695_s17 + $0x40] sm:$0xff] %v875_v27  ;;  %v1176_v29 = vadd.f32 %v1175_v28, %v1174_v26 }
 0x1da   : > { %v1177_v30 = vpop.f32.mrf.mxu1 }
 0x1db   : > { %v878_v31 = vadd.f32 %v1176_v29, %v1692_v17 }
 0x1dc   : > { %v1178_v32 = vpop.f32.mrf.mxu1 }
 0x1dd   : > { %978 = vst [vmem:[%s1695_s17 + $0x48] sm:$0xff] %v878_v31  ;;  %v1179_v33 = vadd.f32 %v1178_v32, %v1177_v30 }
 0x1de   : > { %v1180_v34 = vpop.f32.mrf.mxu1 }
 0x1df   : > { %v883_v35 = vadd.f32 %v1179_v33, %v1692_v17 }
 0x1e0   : > { %v1181_v36 = vpop.f32.mrf.mxu1 }
 0x1e1   : > { %979 = vst [vmem:[%s1695_s17 + $0x50] sm:$0xff] %v883_v35  ;;  %v1182_v37 = vadd.f32 %v1181_v36, %v1180_v34 }
 0x1e2   : > { %v1183_v38 = vpop.f32.mrf.mxu1 }
 0x1e3   : > { %v886_v39 = vadd.f32 %v1182_v37, %v1692_v17 }
 0x1e4   : > { %v1184_v40 = vpop.f32.mrf.mxu1 }
 0x1e5   : > { %980 = vst [vmem:[%s1695_s17 + $0x58] sm:$0xff] %v886_v39  ;;  %v1185_v41 = vadd.f32 %v1184_v40, %v1183_v38 }
 0x1e6   : > { %v1186_v42 = vpop.f32.mrf.mxu1 }
 0x1e7   : > { %v891_v43 = vadd.f32 %v1185_v41, %v1692_v17 }
 0x1e8   : > { %v1187_v44 = vpop.f32.mrf.mxu1 }
 0x1e9   : > { %981 = vst [vmem:[%s1695_s17 + $0x60] sm:$0xff] %v891_v43  ;;  %v1188_v45 = vadd.f32 %v1187_v44, %v1186_v42 }
 0x1ea   : > { %v1189_v46 = vpop.f32.mrf.mxu1 }
 0x1eb   : > { %v894_v47 = vadd.f32 %v1188_v45, %v1692_v17 }
 0x1ec   : > { %v1190_v48 = vpop.f32.mrf.mxu1 }
 0x1ed   : > { %982 = vst [vmem:[%s1695_s17 + $0x68] sm:$0xff] %v894_v47  ;;  %v1191_v49 = vadd.f32 %v1190_v48, %v1189_v46 }
 0x1ee   : > { %v1192_v50 = vpop.f32.mrf.mxu1 }
 0x1ef   : > { %v899_v51 = vadd.f32 %v1191_v49, %v1692_v17 }
 0x1f0   : > { %v1193_v52 = vpop.f32.mrf.mxu1 }
 0x1f1   : > { %983 = vst [vmem:[%s1695_s17 + $0x70] sm:$0xff] %v899_v51  ;;  %v1194_v53 = vadd.f32 %v1193_v52, %v1192_v50 }
 0x1f2   : > { %v1195_v54 = vpop.f32.mrf.mxu1 }
 0x1f3   : > { %v902_v55 = vadd.f32 %v1194_v53, %v1692_v17 }
 0x1f4   : > { %v1196_v56 = vpop.f32.mrf.mxu1 }
 0x1f5   : > { %984 = vst [vmem:[%s1695_s17 + $0x78] sm:$0xff] %v902_v55  ;;  %v1197_v16 = vadd.f32 %v1196_v56, %v1195_v54 }
 0x1f6   : > { %v1198_v57 = vpop.f32.mrf.mxu1 }
 0x1f7   : > { %v907_v58 = vadd.f32 %v1197_v16, %v1692_v17 }
 0x1f8   : > { %v1199_v59 = vpop.f32.mrf.mxu1 }
 0x1f9   : > { %985 = vst [vmem:[%s1695_s17 + $0x80] sm:$0xff] %v907_v58  ;;  %v1200_v60 = vadd.f32 %v1199_v59, %v1198_v57 }
 0x1fa   : > { %v1201_v61 = vpop.f32.mrf.mxu1 }
 0x1fb   : > { %v910_v62 = vadd.f32 %v1200_v60, %v1692_v17 }
 0x1fc   : > { %v1202_v63 = vpop.f32.mrf.mxu1 }
 0x1fd   : > { %986 = vst [vmem:[%s1695_s17 + $0x88] sm:$0xff] %v910_v62  ;;  %v1203_v0 = vadd.f32 %v1202_v63, %v1201_v61 }
 0x1fe   : > { %v1204_v1 = vpop.f32.mrf.mxu1 }
 0x1ff   : > { %v915_v3 = vadd.f32 %v1203_v0, %v1692_v17 }
 0x200   : > { %v1205_v4 = vpop.f32.mrf.mxu1 }
 0x201   : > { %987 = vst [vmem:[%s1695_s17 + $0x90] sm:$0xff] %v915_v3  ;;  %v1206_v5 = vadd.f32 %v1205_v4, %v1204_v1 }
 0x202   : > { %v1207_v6 = vpop.f32.mrf.mxu1 }
 0x203   : > { %v918_v7 = vadd.f32 %v1206_v5, %v1692_v17 }
 0x204   : > { %v1208_v8 = vpop.f32.mrf.mxu1 }
 0x205   : > { %988 = vst [vmem:[%s1695_s17 + $0x98] sm:$0xff] %v918_v7  ;;  %v1209_v9 = vadd.f32 %v1208_v8, %v1207_v6 }
 0x206   : > { %v1210_v10 = vpop.f32.mrf.mxu1 }
 0x207   : > { %v923_v11 = vadd.f32 %v1209_v9, %v1692_v17 }
 0x208   : > { %v1211_v12 = vpop.f32.mrf.mxu1 }
 0x209   : > { %989 = vst [vmem:[%s1695_s17 + $0xa0] sm:$0xff] %v923_v11  ;;  %v1212_v13 = vadd.f32 %v1211_v12, %v1210_v10 }
 0x20a   : > { %v1213_v14 = vpop.f32.mrf.mxu1 }
 0x20b   : > { %v926_v15 = vadd.f32 %v1212_v13, %v1692_v17 }
 0x20c   : > { %v1214_v18 = vpop.f32.mrf.mxu1 }
 0x20d   : > { %990 = vst [vmem:[%s1695_s17 + $0xa8] sm:$0xff] %v926_v15  ;;  %v1215_v2 = vadd.f32 %v1214_v18, %v1213_v14 }
 0x20e   : > { %v1216_v19 = vpop.f32.mrf.mxu1 }
 0x20f   : > { %v931_v20 = vadd.f32 %v1215_v2, %v1692_v17 }
 0x210   : > { %v1217_v21 = vpop.f32.mrf.mxu1 }
 0x211   : > { %991 = vst [vmem:[%s1695_s17 + $0xb0] sm:$0xff] %v931_v20  ;;  %v1218_v22 = vadd.f32 %v1217_v21, %v1216_v19 }
 0x212   : > { %v1219_v23 = vpop.f32.mrf.mxu1 }
 0x213   : > { %v934_v24 = vadd.f32 %v1218_v22, %v1692_v17 }
 0x214   : > { %v1220_v25 = vpop.f32.mrf.mxu1 }
 0x215   : > { %992 = vst [vmem:[%s1695_s17 + $0xb8] sm:$0xff] %v934_v24  ;;  %v1221_v26 = vadd.f32 %v1220_v25, %v1219_v23 }
 0x216   : > { %v1222_v27 = vpop.f32.mrf.mxu1 }
 0x217   : > { %v939_v28 = vadd.f32 %v1221_v26, %v1692_v17 }
 0x218   : > { %v1223_v29 = vpop.f32.mrf.mxu1 }
 0x219   : > { %993 = vst [vmem:[%s1695_s17 + $0xc0] sm:$0xff] %v939_v28  ;;  %v1224_v30 = vadd.f32 %v1223_v29, %v1222_v27 }
 0x21a   : > { %v1225_v31 = vpop.f32.mrf.mxu1 }
 0x21b   : > { %v942_v32 = vadd.f32 %v1224_v30, %v1692_v17 }
 0x21c   : > { %v1226_v33 = vpop.f32.mrf.mxu1 }
 0x21d   : > { %994 = vst [vmem:[%s1695_s17 + $0xc8] sm:$0xff] %v942_v32  ;;  %v1227_v34 = vadd.f32 %v1226_v33, %v1225_v31 }
 0x21e   : > { %v1228_v35 = vpop.f32.mrf.mxu1 }
 0x21f   : > { %v947_v36 = vadd.f32 %v1227_v34, %v1692_v17 }
 0x220   : > { %v1229_v37 = vpop.f32.mrf.mxu1 }
 0x221   : > { %995 = vst [vmem:[%s1695_s17 + $0xd0] sm:$0xff] %v947_v36  ;;  %v1230_v38 = vadd.f32 %v1229_v37, %v1228_v35 }
 0x222   : > { %v1231_v39 = vpop.f32.mrf.mxu1 }
 0x223   : > { %v950_v40 = vadd.f32 %v1230_v38, %v1692_v17 }
 0x224   : > { %v1232_v41 = vpop.f32.mrf.mxu1 }
 0x225   : > { %996 = vst [vmem:[%s1695_s17 + $0xd8] sm:$0xff] %v950_v40  ;;  %v1233_v42 = vadd.f32 %v1232_v41, %v1231_v39 }
 0x226   : > { %v1234_v43 = vpop.f32.mrf.mxu1 }
 0x227   : > { %v955_v44 = vadd.f32 %v1233_v42, %v1692_v17 }
 0x228   : > { %v1235_v45 = vpop.f32.mrf.mxu1 }
 0x229   : > { %997 = vst [vmem:[%s1695_s17 + $0xe0] sm:$0xff] %v955_v44  ;;  %v1236_v46 = vadd.f32 %v1235_v45, %v1234_v43 }
 0x22a   : > { %v1237_v47 = vpop.f32.mrf.mxu1 }
 0x22b   : > { %v958_v48 = vadd.f32 %v1236_v46, %v1692_v17 }
 0x22c   : > { %v1238_v49 = vpop.f32.mrf.mxu1 }
 0x22d   : > { %998 = vst [vmem:[%s1695_s17 + $0xe8] sm:$0xff] %v958_v48  ;;  %v1239_v50 = vadd.f32 %v1238_v49, %v1237_v47 }
 0x22e   : > { %v1240_v51 = vpop.f32.mrf.mxu1 }
 0x22f   : > { %v963_v52 = vadd.f32 %v1239_v50, %v1692_v17 }
 0x230   : > { %v1241_v53 = vpop.f32.mrf.mxu1 }
 0x231   : > { %999 = vst [vmem:[%s1695_s17 + $0xf0] sm:$0xff] %v963_v52  ;;  %v1242_v54 = vadd.f32 %v1241_v53, %v1240_v51 }
 0x233   : > { %v966_v55 = vadd.f32 %v1242_v54, %v1692_v17 }
 0x235   : > { %1000 = vst [vmem:[%s1695_s17 + $0xf8] sm:$0xff] %v966_v55 }
 0x236   : > { %1342 = shalt.err (!%p1339_p3)
}
 0x237   : > { %s1343_s12 = scalar_lea.hbm %s1763_s6, 4096  ;;  %s1347_s14 = scalar_lea.hbm %s1816_s5, 8192 }
 0x238   : > { %p1344_p4 = scmp.ne.s32.totalorder %s1763_s6, %s1343_s12  ;;  %p1348_p9 = scmp.lt.s32.totalorder %s1763_s6, %s1816_s5 }
 0x239   : > { %p1349_p10 = scmp.lt.s32.totalorder %s1347_s14, %s1343_s12 }
 0x23a   : > { %p1345_p7 = pnand %p1344_p4, %p1463_p5 }
 0x23b   : > { %p1350_p11 = por %p1349_p10, %p1348_p9 }
 0x23c   : > { %p1346_p8 = pneg %p1345_p7 }
 0x23e   : > { %p1351_p12 = pnand %p1350_p11, %p1346_p8 }
 0x240   : > { %1354 = shalt.err (!%p1351_p12)
}
 0x241   : > { %s1393_s17 = smov 128   ;;  %s1394_s23 = smov 8  }
 0x242   : > { %1259 = dma.vmem_to_hbm [thread:$0]  (%p1463_p5), %s1765_s25, 4096, %s1763_s6, %s1771_s7, %s1393_s17, %s1393_s17, %s1394_s23  }
 0x243 PF: > { %p1265_p13 = scmp.ge.s32.totalorder %s1389_s21, 2  ;;  %s1030_s26 = sand.u32 1, %s1377_s18  }
 0x244   : > { %s1031_s30 = scalar_lea.sflag [#allocation3], %s1030_s26 }
 0x245   : > { %p1262_p0 = pnand %p1265_p13, %p1467_p6 }
 0x247   : > { %p1263_p1 = pneg %p1262_p0 }
 0x249   : > { %1372 = dma.done.wait (%p1263_p1), %s1031_s30, 4096  }
 0x24a   : > { %1374 = vsyncadd (%p1263_p1), %s1031_s30, 4294963200  ;;  %p15_p2 = scmp.ge.s32.totalorder %s1450_s24, 4   ;;  %s1819_s18 = smov %s1381_s19 }
 0x24b   : > { %s1820_s19 = smov %s1385_s20  ;;  %s1821_s20 = smov %s1461_s27 }
 0x24c   : > { %s1822_s21 = smov %s1450_s24  ;;  %17 = sbr.rel (!%p15_p2) target bundleno = 3 (0x3), region = 75 }
 0x251   :  { %1036 = vsyncpa [#allocation3], 1 }
 0x252   :  { %1038 = vsyncpa [#allocation3 + $0x1], 1 }

</bundles_post_ra>
